<compile_context>
chip_gen: v7x
topology: tpu7x:2x2x1
jax: 0.10.0
libtpu: 0.0.40
codegen_flags: <defaults>
</compile_context>

<pallas_src>
import functools

import jax
import jax.numpy as jnp
from jax import lax
from jax.experimental import pallas as pl
from jax.experimental.pallas import tpu as pltpu

MAX_REL = 4  # max_relative_pos in the PyTorch module


def _encoder_layer_kernel(n_heads, head_dim, hid_dim, attn_scale,
                          src_ref, mask_ref, rel_ref,
                          wqkv_ref, bqkv_ref, wo_ref,
                          w1_ref, b1_ref, w2_ref, vecs_ref,
                          out_ref):
    src = src_ref[0]        # (L, H)
    mask = mask_ref[0]      # (1, L)  1.0 = keep, 0.0 = masked key position
    rel = rel_ref[...]      # (L, L, Dh) relative-position embeddings

    H = hid_dim
    Dh = head_dim
    inv_scale = 1.0 / attn_scale

    # packed small vectors: rows are [bo, g1, be1, g2, be2, b2], each (1, H)
    vecs = vecs_ref[...]
    bo, g1, be1, g2, be2, b2 = tuple(vecs[i:i + 1, :] for i in range(6))

    # fused QKV projection: one MXU pass with 3x wider N instead of three small matmuls
    qkv = jnp.dot(src, wqkv_ref[...],
                  preferred_element_type=jnp.float32) + bqkv_ref[...]   # (L, 3H)

    # additive mask bias, hoisted out of the head loop (keys-only mask)
    mask_bias = jnp.where(mask > 0.0,
                          jnp.float32(0.0), jnp.float32(-1e10))         # (1, L)

    wo = wo_ref[...]        # (H, H)

    x = jnp.zeros_like(src)  # accumulated multi-head output projection (L, H)
    for h in range(n_heads):                     # static loop over heads
        qh = qkv[:, h * Dh:(h + 1) * Dh]                    # (L, Dh)
        kh = qkv[:, H + h * Dh:H + (h + 1) * Dh]            # (L, Dh)
        vh = qkv[:, 2 * H + h * Dh:2 * H + (h + 1) * Dh]    # (L, Dh)

        # energy1 = Q @ K^T  (MXU)
        e1 = lax.dot_general(qh, kh, (((1,), (1,)), ((), ())),
                             preferred_element_type=jnp.float32)        # (L, L)
        # energy2[i, j] = sum_d Q[i, d] * rel[i, j, d]  (MXU, batched over i)
        e2 = lax.dot_general(qh[:, None, :], rel,
                             (((2,), (2,)), ((0,), (0,))),
                             preferred_element_type=jnp.float32)[:, 0, :]  # (L, L)

        energy = (e1 + e2) * inv_scale + mask_bias
        m = jnp.max(energy, axis=-1, keepdims=True)
        p = jnp.exp(energy - m)
        attn = p * pl.reciprocal(jnp.sum(p, axis=-1, keepdims=True),
                                 approx=True)                            # softmax

        # attention @ V  (MXU)
        av = jnp.dot(attn, vh, preferred_element_type=jnp.float32)       # (L, Dh)
        # attention_tem[i, d] = sum_j attn[i, j] * rel[i, j, d]  (MXU, batched over i)
        at = lax.dot_general(attn[:, None, :], rel,
                             (((2,), (1,)), ((0,), (0,))),
                             preferred_element_type=jnp.float32)[:, 0, :]  # (L, Dh)

        # per-head slice of the output projection -> avoids lane concatenation
        x = x + jnp.dot(av + at, wo[h * Dh:(h + 1) * Dh, :],
                        preferred_element_type=jnp.float32)
    x = x + bo

    # residual + LayerNorm 1 (eps = 1e-5, biased variance, matches nn.LayerNorm)
    y = src + x
    mu = jnp.mean(y, axis=-1, keepdims=True)
    var = jnp.mean((y - mu) ** 2, axis=-1, keepdims=True)
    y = (y - mu) * lax.rsqrt(var + 1e-5) * g1 + be1

    # positionwise feed-forward
    f = jnp.dot(y, w1_ref[...], preferred_element_type=jnp.float32) + b1_ref[...]
    f = jnp.maximum(f, 0.0)
    f = jnp.dot(f, w2_ref[...], preferred_element_type=jnp.float32) + b2

    # residual + LayerNorm 2
    z = y + f
    mu2 = jnp.mean(z, axis=-1, keepdims=True)
    var2 = jnp.mean((z - mu2) ** 2, axis=-1, keepdims=True)
    z = (z - mu2) * lax.rsqrt(var2 + 1e-5) * g2 + be2

    out_ref[0] = z


def encoder_layer(src, mask, rel, lp, n_heads, head_dim):
    B, L, H = src.shape
    P = lp["w1"].shape[1]
    Dh = head_dim

    # host-side packing: fused QKV weights / bias, and the six (1, H) small vectors
    wqkv = jnp.concatenate([lp["wq"], lp["wk"], lp["wv"]], axis=1)      # (H, 3H)
    bqkv = jnp.concatenate([lp["bq"], lp["bk"], lp["bv"]], axis=1)      # (1, 3H)
    vecs = jnp.concatenate([lp["bo"], lp["g1"], lp["be1"],
                            lp["g2"], lp["be2"], lp["b2"]], axis=0)     # (6, H)

    kern = functools.partial(_encoder_layer_kernel, n_heads, head_dim, H,
                             float(head_dim) ** 0.5)

    def rep2(shape):
        return pl.BlockSpec(shape, lambda b: (0, 0))

    def rep3(shape):
        return pl.BlockSpec(shape, lambda b: (0, 0, 0))

    return pl.pallas_call(
        kern,
        out_shape=jax.ShapeDtypeStruct((B, L, H), jnp.float32),
        grid=(B,),
        in_specs=[
            pl.BlockSpec((1, L, H), lambda b: (b, 0, 0)),   # src
            pl.BlockSpec((1, 1, L), lambda b: (b, 0, 0)),   # mask
            rep3((L, L, Dh)),                               # rel
            rep2((H, 3 * H)), rep2((1, 3 * H)),             # fused Wqkv, bqkv
            rep2((H, H)),                                   # wo
            rep2((H, P)), rep2((1, P)),                     # ff w1, b1
            rep2((P, H)),                                   # ff w2
            rep2((6, H)),                                   # packed bo/g1/be1/g2/be2/b2
        ],
        out_specs=pl.BlockSpec((1, L, H), lambda b: (b, 0, 0)),
        compiler_params=pltpu.CompilerParams(
            dimension_semantics=("parallel",)),
    )(src, mask, rel, wqkv, bqkv, lp["wo"], lp["w1"], lp["b1"], lp["w2"], vecs)


def encoder_forward(src_ids, src_mask, params, n_heads, head_dim):
    """src_ids: (B, L) int32 token ids; src_mask: (B, 1, L) float (1 keep / 0 pad)."""
    B, L = src_ids.shape
    H = params["tok_emb"].shape[1]
    scale = jnp.sqrt(jnp.float32(H))

    # glue: embedding gathers (no clean Pallas equivalent for a table gather at this size)
    tok = params["tok_emb"][src_ids]                       # (B, L, H)
    pos = params["pos_emb"][jnp.arange(L)][None, :, :]     # (1, L, H)
    x = tok * scale + pos                                  # dropout == identity

    # relative-position index table (same for every layer; each layer has its own emb)
    i = jnp.arange(L)[:, None]
    j = jnp.arange(L)[None, :]
    pos_abs = jnp.clip(i - j, -MAX_REL, MAX_REL) + MAX_REL  # (L, L) in [0, 2*MAX_REL]

    # TODO(synk): for large L, avoid materializing the (L, L, Dh) rel table entirely
    # (Shaw-style trick: q @ table.T -> (L, 2*MAX_REL+1), expand by relative offset).
    for lp in params["layers"]:
        rel = lp["rel_emb"][pos_abs]                        # (L, L, Dh) glue gather
        x = encoder_layer(x, src_mask, rel, lp, n_heads, head_dim)
    return x


def init_params(key, input_dim, hid, n_layers, n_heads, pf, max_len):
    head_dim = hid // n_heads
    keys = jax.random.split(key, 2 + n_layers)
    params = {
        "tok_emb": 0.02 * jax.random.normal(keys[0], (input_dim, hid), jnp.float32),
        "pos_emb": 0.02 * jax.random.normal(keys[1], (max_len, hid), jnp.float32),
        "layers": [],
    }
    for li in range(n_layers):
        ks = jax.random.split(keys[2 + li], 12)
        lp = {
            "wq": 0.05 * jax.random.normal(ks[0], (hid, hid), jnp.float32),
            "bq": 0.01 * jax.random.normal(ks[1], (1, hid), jnp.float32),
            "wk": 0.05 * jax.random.normal(ks[2], (hid, hid), jnp.float32),
            "bk": 0.01 * jax.random.normal(ks[3], (1, hid), jnp.float32),
            "wv": 0.05 * jax.random.normal(ks[4], (hid, hid), jnp.float32),
            "bv": 0.01 * jax.random.normal(ks[5], (1, hid), jnp.float32),
            "wo": 0.05 * jax.random.normal(ks[6], (hid, hid), jnp.float32),
            "bo": 0.01 * jax.random.normal(ks[7], (1, hid), jnp.float32),
            "g1": jnp.ones((1, hid), jnp.float32),
            "be1": jnp.zeros((1, hid), jnp.float32),
            "g2": jnp.ones((1, hid), jnp.float32),
            "be2": jnp.zeros((1, hid), jnp.float32),
            "w1": 0.05 * jax.random.normal(ks[8], (hid, pf), jnp.float32),
            "b1": 0.01 * jax.random.normal(ks[9], (1, pf), jnp.float32),
            "w2": 0.05 * jax.random.normal(ks[10], (pf, hid), jnp.float32),
            "b2": 0.01 * jax.random.normal(ks[11], (1, hid), jnp.float32),
            "rel_emb": 0.05 * jax.random.normal(
                jax.random.fold_in(ks[0], 777),
                (2 * MAX_REL + 1, head_dim), jnp.float32),
        }
        params["layers"].append(lp)
    return params


if __name__ == "__main__":
    INPUT_DIM = 50     # vocab size
    HID = 32
    N_LAYERS = 2
    N_HEADS = 4
    PF_DIM = 64
    MAX_LEN = 100
    B, L = 2, 8
    HEAD_DIM = HID // N_HEADS

    root = jax.random.PRNGKey(0)
    k_params, k_ids = jax.random.split(root)

    params = init_params(k_params, INPUT_DIM, HID, N_LAYERS, N_HEADS, PF_DIM, MAX_LEN)

    src_ids = jax.random.randint(k_ids, (B, L), 0, INPUT_DIM, dtype=jnp.int32)
    # simple padding mask: second sequence has 2 padded positions at the end
    lengths = jnp.array([L, L - 2])
    src_mask = (jnp.arange(L)[None, :] < lengths[:, None]).astype(jnp.float32)  # (B, L)
    src_mask = src_mask[:, None, :]                                             # (B, 1, L)

    out = encoder_forward(src_ids, src_mask, params, N_HEADS, HEAD_DIM)
    out = jax.block_until_ready(out)
    assert out.shape == (B, L, HID)
    print("KERNEL_OK")
</pallas_src>

<mosaic_0001>
module attributes {stable_mosaic.version = 11 : i64} {
  func.func @_encoder_layer_kernel(%arg0: i32, %arg1: memref<1x8x32xf32, #tpu.memory_space<vmem>>, %arg2: memref<1x1x8xf32, #tpu.memory_space<vmem>>, %arg3: memref<8x8x8xf32, #tpu.memory_space<vmem>>, %arg4: memref<32x96xf32, #tpu.memory_space<vmem>>, %arg5: memref<1x96xf32, #tpu.memory_space<vmem>>, %arg6: memref<32x32xf32, #tpu.memory_space<vmem>>, %arg7: memref<32x64xf32, #tpu.memory_space<vmem>>, %arg8: memref<1x64xf32, #tpu.memory_space<vmem>>, %arg9: memref<64x32xf32, #tpu.memory_space<vmem>>, %arg10: memref<6x32xf32, #tpu.memory_space<vmem>>, %arg11: memref<1x8x32xf32, #tpu.memory_space<vmem>>) attributes {dimension_semantics = [#tpu.dimension_semantics<parallel>], iteration_bounds = array<i64: 2>, scalar_prefetch = 0 : i64, scratch_operands = 0 : i64, tpu.core_type = #tpu.core_type<tc>, window_params = [{transform_indices = @transform_0, window_bounds = array<i64: 1, 8, 32>}, {transform_indices = @transform_1, window_bounds = array<i64: 1, 1, 8>}, {pipeline_mode = #tpu.pipeline_mode<synchronous>, transform_indices = @transform_2, window_bounds = array<i64: 8, 8, 8>}, {pipeline_mode = #tpu.pipeline_mode<synchronous>, transform_indices = @transform_3, window_bounds = array<i64: 32, 96>}, {pipeline_mode = #tpu.pipeline_mode<synchronous>, transform_indices = @transform_4, window_bounds = array<i64: 1, 96>}, {pipeline_mode = #tpu.pipeline_mode<synchronous>, transform_indices = @transform_5, window_bounds = array<i64: 32, 32>}, {pipeline_mode = #tpu.pipeline_mode<synchronous>, transform_indices = @transform_6, window_bounds = array<i64: 32, 64>}, {pipeline_mode = #tpu.pipeline_mode<synchronous>, transform_indices = @transform_7, window_bounds = array<i64: 1, 64>}, {pipeline_mode = #tpu.pipeline_mode<synchronous>, transform_indices = @transform_8, window_bounds = array<i64: 64, 32>}, {pipeline_mode = #tpu.pipeline_mode<synchronous>, transform_indices = @transform_9, window_bounds = array<i64: 6, 32>}, {transform_indices = @transform_10, window_bounds = array<i64: 1, 8, 32>}]} {
    %c0 = arith.constant 0 : index
    %c0_0 = arith.constant 0 : index
    %c0_1 = arith.constant 0 : index
    %0 = vector.load %arg1[%c0, %c0_0, %c0_1] : memref<1x8x32xf32, #tpu.memory_space<vmem>>, vector<1x8x32xf32>
    %1 = vector.shape_cast %0 : vector<1x8x32xf32> to vector<8x32xf32>
    %c0_2 = arith.constant 0 : index
    %c0_3 = arith.constant 0 : index
    %c0_4 = arith.constant 0 : index
    %2 = vector.load %arg2[%c0_2, %c0_3, %c0_4] : memref<1x1x8xf32, #tpu.memory_space<vmem>>, vector<1x1x8xf32>
    %3 = vector.shape_cast %2 : vector<1x1x8xf32> to vector<1x8xf32>
    %c0_5 = arith.constant 0 : index
    %c0_6 = arith.constant 0 : index
    %c0_7 = arith.constant 0 : index
    %4 = vector.load %arg3[%c0_5, %c0_6, %c0_7] : memref<8x8x8xf32, #tpu.memory_space<vmem>>, vector<8x8x8xf32>
    %c0_8 = arith.constant 0 : index
    %c0_9 = arith.constant 0 : index
    %5 = vector.load %arg10[%c0_8, %c0_9] : memref<6x32xf32, #tpu.memory_space<vmem>>, vector<6x32xf32>
    %6 = vector.extract_strided_slice %5 {offsets = [0, 0], sizes = [1, 32], strides = [1, 1]} : vector<6x32xf32> to vector<1x32xf32>
    %7 = vector.extract_strided_slice %5 {offsets = [1, 0], sizes = [1, 32], strides = [1, 1]} : vector<6x32xf32> to vector<1x32xf32>
    %8 = vector.extract_strided_slice %5 {offsets = [2, 0], sizes = [1, 32], strides = [1, 1]} : vector<6x32xf32> to vector<1x32xf32>
    %9 = vector.extract_strided_slice %5 {offsets = [3, 0], sizes = [1, 32], strides = [1, 1]} : vector<6x32xf32> to vector<1x32xf32>
    %10 = vector.extract_strided_slice %5 {offsets = [4, 0], sizes = [1, 32], strides = [1, 1]} : vector<6x32xf32> to vector<1x32xf32>
    %11 = vector.extract_strided_slice %5 {offsets = [5, 0], sizes = [1, 32], strides = [1, 1]} : vector<6x32xf32> to vector<1x32xf32>
    %c0_10 = arith.constant 0 : index
    %c0_11 = arith.constant 0 : index
    %12 = vector.load %arg4[%c0_10, %c0_11] : memref<32x96xf32, #tpu.memory_space<vmem>>, vector<32x96xf32>
    %cst = arith.constant dense<0.000000e+00> : vector<8x96xf32>
    %13 = tpu.matmul %1, %12, %cst {dimension_numbers = #tpu.dot_dimension_numbers<[1], [0], [0], [1], [0, 0, 1, 1], [], []>} : vector<8x32xf32>, vector<32x96xf32>, vector<8x96xf32> -> vector<8x96xf32>
    %c0_12 = arith.constant 0 : index
    %c0_13 = arith.constant 0 : index
    %14 = vector.load %arg5[%c0_12, %c0_13] : memref<1x96xf32, #tpu.memory_space<vmem>>, vector<1x96xf32>
    %15 = vector.broadcast %14 : vector<1x96xf32> to vector<8x96xf32>
    %16 = arith.addf %13, %15 : vector<8x96xf32>
    %cst_14 = arith.constant 0.000000e+00 : f32
    %17 = vector.broadcast %cst_14 : f32 to vector<1x8xf32>
    %18 = arith.cmpf ogt, %3, %17 : vector<1x8xf32>
    %cst_15 = arith.constant 0.000000e+00 : f32
    %cst_16 = arith.constant -1.000000e+10 : f32
    %19 = vector.broadcast %cst_15 : f32 to vector<1x8xf32>
    %20 = vector.broadcast %cst_16 : f32 to vector<1x8xf32>
    %21 = arith.select %18, %19, %20 : vector<1x8xi1>, vector<1x8xf32>
    %c0_17 = arith.constant 0 : index
    %c0_18 = arith.constant 0 : index
    %22 = vector.load %arg6[%c0_17, %c0_18] : memref<32x32xf32, #tpu.memory_space<vmem>>, vector<32x32xf32>
    %cst_19 = arith.constant 0.000000e+00 : f32
    %23 = vector.broadcast %cst_19 : f32 to vector<8x32xf32>
    %24 = vector.extract_strided_slice %16 {offsets = [0, 0], sizes = [8, 8], strides = [1, 1]} : vector<8x96xf32> to vector<8x8xf32>
    %25 = vector.extract_strided_slice %16 {offsets = [0, 32], sizes = [8, 8], strides = [1, 1]} : vector<8x96xf32> to vector<8x8xf32>
    %26 = vector.extract_strided_slice %16 {offsets = [0, 64], sizes = [8, 8], strides = [1, 1]} : vector<8x96xf32> to vector<8x8xf32>
    %cst_20 = arith.constant dense<0.000000e+00> : vector<8x8xf32>
    %27 = tpu.matmul %24, %25, %cst_20 {dimension_numbers = #tpu.dot_dimension_numbers<[1], [1], [0], [0], [0, 0, 1, 0], [], []>} : vector<8x8xf32>, vector<8x8xf32>, vector<8x8xf32> -> vector<8x8xf32>
    %28 = vector.shape_cast %24 : vector<8x8xf32> to vector<8x1x8xf32>
    %cst_21 = arith.constant dense<0.000000e+00> : vector<8x1x8xf32>
    %29 = tpu.matmul %28, %4, %cst_21 {dimension_numbers = #tpu.dot_dimension_numbers<[2], [2], [1], [1], [0, 0, 0, 1, 1, 1], [0], [0]>} : vector<8x1x8xf32>, vector<8x8x8xf32>, vector<8x1x8xf32> -> vector<8x1x8xf32>
    %30 = vector.shape_cast %29 : vector<8x1x8xf32> to vector<8x8xf32>
    %31 = arith.addf %27, %30 : vector<8x8xf32>
    %cst_22 = arith.constant 0.353553385 : f32
    %32 = vector.broadcast %cst_22 : f32 to vector<8x8xf32>
    %33 = arith.mulf %31, %32 : vector<8x8xf32>
    %34 = vector.broadcast %21 : vector<1x8xf32> to vector<8x8xf32>
    %35 = arith.addf %33, %34 : vector<8x8xf32>
    %cst_23 = arith.constant dense<0xFF800000> : vector<8xf32>
    %36 = vector.multi_reduction <maximumf>, %35, %cst_23 [1] : vector<8x8xf32> to vector<8xf32>
    %37 = vector.shape_cast %36 : vector<8xf32> to vector<8x1xf32>
    %38 = vector.broadcast %37 : vector<8x1xf32> to vector<8x8xf32>
    %39 = arith.subf %35, %38 : vector<8x8xf32>
    %40 = math.exp %39 : vector<8x8xf32>
    %cst_24 = arith.constant dense<0.000000e+00> : vector<8xf32>
    %41 = vector.multi_reduction <add>, %40, %cst_24 [1] : vector<8x8xf32> to vector<8xf32>
    %42 = vector.shape_cast %41 : vector<8xf32> to vector<8x1xf32>
    %43 = tpu.reciprocal %42 {approx = true} : vector<8x1xf32> -> vector<8x1xf32>
    %44 = vector.broadcast %43 : vector<8x1xf32> to vector<8x8xf32>
    %45 = arith.mulf %40, %44 : vector<8x8xf32>
    %cst_25 = arith.constant dense<0.000000e+00> : vector<8x8xf32>
    %46 = tpu.matmul %45, %26, %cst_25 {dimension_numbers = #tpu.dot_dimension_numbers<[1], [0], [0], [1], [0, 0, 1, 1], [], []>} : vector<8x8xf32>, vector<8x8xf32>, vector<8x8xf32> -> vector<8x8xf32>
    %47 = vector.shape_cast %45 : vector<8x8xf32> to vector<8x1x8xf32>
    %cst_26 = arith.constant dense<0.000000e+00> : vector<8x1x8xf32>
    %48 = tpu.matmul %47, %4, %cst_26 {dimension_numbers = #tpu.dot_dimension_numbers<[2], [1], [1], [2], [0, 0, 0, 1, 1, 2], [0], [0]>} : vector<8x1x8xf32>, vector<8x8x8xf32>, vector<8x1x8xf32> -> vector<8x1x8xf32>
    %49 = vector.shape_cast %48 : vector<8x1x8xf32> to vector<8x8xf32>
    %50 = arith.addf %46, %49 : vector<8x8xf32>
    %51 = vector.extract_strided_slice %22 {offsets = [0, 0], sizes = [8, 32], strides = [1, 1]} : vector<32x32xf32> to vector<8x32xf32>
    %cst_27 = arith.constant dense<0.000000e+00> : vector<8x32xf32>
    %52 = tpu.matmul %50, %51, %cst_27 {dimension_numbers = #tpu.dot_dimension_numbers<[1], [0], [0], [1], [0, 0, 1, 1], [], []>} : vector<8x8xf32>, vector<8x32xf32>, vector<8x32xf32> -> vector<8x32xf32>
    %53 = arith.addf %23, %52 : vector<8x32xf32>
    %54 = vector.extract_strided_slice %16 {offsets = [0, 8], sizes = [8, 8], strides = [1, 1]} : vector<8x96xf32> to vector<8x8xf32>
    %55 = vector.extract_strided_slice %16 {offsets = [0, 40], sizes = [8, 8], strides = [1, 1]} : vector<8x96xf32> to vector<8x8xf32>
    %56 = vector.extract_strided_slice %16 {offsets = [0, 72], sizes = [8, 8], strides = [1, 1]} : vector<8x96xf32> to vector<8x8xf32>
    %cst_28 = arith.constant dense<0.000000e+00> : vector<8x8xf32>
    %57 = tpu.matmul %54, %55, %cst_28 {dimension_numbers = #tpu.dot_dimension_numbers<[1], [1], [0], [0], [0, 0, 1, 0], [], []>} : vector<8x8xf32>, vector<8x8xf32>, vector<8x8xf32> -> vector<8x8xf32>
    %58 = vector.shape_cast %54 : vector<8x8xf32> to vector<8x1x8xf32>
    %cst_29 = arith.constant dense<0.000000e+00> : vector<8x1x8xf32>
    %59 = tpu.matmul %58, %4, %cst_29 {dimension_numbers = #tpu.dot_dimension_numbers<[2], [2], [1], [1], [0, 0, 0, 1, 1, 1], [0], [0]>} : vector<8x1x8xf32>, vector<8x8x8xf32>, vector<8x1x8xf32> -> vector<8x1x8xf32>
    %60 = vector.shape_cast %59 : vector<8x1x8xf32> to vector<8x8xf32>
    %61 = arith.addf %57, %60 : vector<8x8xf32>
    %cst_30 = arith.constant 0.353553385 : f32
    %62 = vector.broadcast %cst_30 : f32 to vector<8x8xf32>
    %63 = arith.mulf %61, %62 : vector<8x8xf32>
    %64 = vector.broadcast %21 : vector<1x8xf32> to vector<8x8xf32>
    %65 = arith.addf %63, %64 : vector<8x8xf32>
    %cst_31 = arith.constant dense<0xFF800000> : vector<8xf32>
    %66 = vector.multi_reduction <maximumf>, %65, %cst_31 [1] : vector<8x8xf32> to vector<8xf32>
    %67 = vector.shape_cast %66 : vector<8xf32> to vector<8x1xf32>
    %68 = vector.broadcast %67 : vector<8x1xf32> to vector<8x8xf32>
    %69 = arith.subf %65, %68 : vector<8x8xf32>
    %70 = math.exp %69 : vector<8x8xf32>
    %cst_32 = arith.constant dense<0.000000e+00> : vector<8xf32>
    %71 = vector.multi_reduction <add>, %70, %cst_32 [1] : vector<8x8xf32> to vector<8xf32>
    %72 = vector.shape_cast %71 : vector<8xf32> to vector<8x1xf32>
    %73 = tpu.reciprocal %72 {approx = true} : vector<8x1xf32> -> vector<8x1xf32>
    %74 = vector.broadcast %73 : vector<8x1xf32> to vector<8x8xf32>
    %75 = arith.mulf %70, %74 : vector<8x8xf32>
    %cst_33 = arith.constant dense<0.000000e+00> : vector<8x8xf32>
    %76 = tpu.matmul %75, %56, %cst_33 {dimension_numbers = #tpu.dot_dimension_numbers<[1], [0], [0], [1], [0, 0, 1, 1], [], []>} : vector<8x8xf32>, vector<8x8xf32>, vector<8x8xf32> -> vector<8x8xf32>
    %77 = vector.shape_cast %75 : vector<8x8xf32> to vector<8x1x8xf32>
    %cst_34 = arith.constant dense<0.000000e+00> : vector<8x1x8xf32>
    %78 = tpu.matmul %77, %4, %cst_34 {dimension_numbers = #tpu.dot_dimension_numbers<[2], [1], [1], [2], [0, 0, 0, 1, 1, 2], [0], [0]>} : vector<8x1x8xf32>, vector<8x8x8xf32>, vector<8x1x8xf32> -> vector<8x1x8xf32>
    %79 = vector.shape_cast %78 : vector<8x1x8xf32> to vector<8x8xf32>
    %80 = arith.addf %76, %79 : vector<8x8xf32>
    %81 = vector.extract_strided_slice %22 {offsets = [8, 0], sizes = [8, 32], strides = [1, 1]} : vector<32x32xf32> to vector<8x32xf32>
    %cst_35 = arith.constant dense<0.000000e+00> : vector<8x32xf32>
    %82 = tpu.matmul %80, %81, %cst_35 {dimension_numbers = #tpu.dot_dimension_numbers<[1], [0], [0], [1], [0, 0, 1, 1], [], []>} : vector<8x8xf32>, vector<8x32xf32>, vector<8x32xf32> -> vector<8x32xf32>
    %83 = arith.addf %53, %82 : vector<8x32xf32>
    %84 = vector.extract_strided_slice %16 {offsets = [0, 16], sizes = [8, 8], strides = [1, 1]} : vector<8x96xf32> to vector<8x8xf32>
    %85 = vector.extract_strided_slice %16 {offsets = [0, 48], sizes = [8, 8], strides = [1, 1]} : vector<8x96xf32> to vector<8x8xf32>
    %86 = vector.extract_strided_slice %16 {offsets = [0, 80], sizes = [8, 8], strides = [1, 1]} : vector<8x96xf32> to vector<8x8xf32>
    %cst_36 = arith.constant dense<0.000000e+00> : vector<8x8xf32>
    %87 = tpu.matmul %84, %85, %cst_36 {dimension_numbers = #tpu.dot_dimension_numbers<[1], [1], [0], [0], [0, 0, 1, 0], [], []>} : vector<8x8xf32>, vector<8x8xf32>, vector<8x8xf32> -> vector<8x8xf32>
    %88 = vector.shape_cast %84 : vector<8x8xf32> to vector<8x1x8xf32>
    %cst_37 = arith.constant dense<0.000000e+00> : vector<8x1x8xf32>
    %89 = tpu.matmul %88, %4, %cst_37 {dimension_numbers = #tpu.dot_dimension_numbers<[2], [2], [1], [1], [0, 0, 0, 1, 1, 1], [0], [0]>} : vector<8x1x8xf32>, vector<8x8x8xf32>, vector<8x1x8xf32> -> vector<8x1x8xf32>
    %90 = vector.shape_cast %89 : vector<8x1x8xf32> to vector<8x8xf32>
    %91 = arith.addf %87, %90 : vector<8x8xf32>
    %cst_38 = arith.constant 0.353553385 : f32
    %92 = vector.broadcast %cst_38 : f32 to vector<8x8xf32>
    %93 = arith.mulf %91, %92 : vector<8x8xf32>
    %94 = vector.broadcast %21 : vector<1x8xf32> to vector<8x8xf32>
    %95 = arith.addf %93, %94 : vector<8x8xf32>
    %cst_39 = arith.constant dense<0xFF800000> : vector<8xf32>
    %96 = vector.multi_reduction <maximumf>, %95, %cst_39 [1] : vector<8x8xf32> to vector<8xf32>
    %97 = vector.shape_cast %96 : vector<8xf32> to vector<8x1xf32>
    %98 = vector.broadcast %97 : vector<8x1xf32> to vector<8x8xf32>
    %99 = arith.subf %95, %98 : vector<8x8xf32>
    %100 = math.exp %99 : vector<8x8xf32>
    %cst_40 = arith.constant dense<0.000000e+00> : vector<8xf32>
    %101 = vector.multi_reduction <add>, %100, %cst_40 [1] : vector<8x8xf32> to vector<8xf32>
    %102 = vector.shape_cast %101 : vector<8xf32> to vector<8x1xf32>
    %103 = tpu.reciprocal %102 {approx = true} : vector<8x1xf32> -> vector<8x1xf32>
    %104 = vector.broadcast %103 : vector<8x1xf32> to vector<8x8xf32>
    %105 = arith.mulf %100, %104 : vector<8x8xf32>
    %cst_41 = arith.constant dense<0.000000e+00> : vector<8x8xf32>
    %106 = tpu.matmul %105, %86, %cst_41 {dimension_numbers = #tpu.dot_dimension_numbers<[1], [0], [0], [1], [0, 0, 1, 1], [], []>} : vector<8x8xf32>, vector<8x8xf32>, vector<8x8xf32> -> vector<8x8xf32>
    %107 = vector.shape_cast %105 : vector<8x8xf32> to vector<8x1x8xf32>
    %cst_42 = arith.constant dense<0.000000e+00> : vector<8x1x8xf32>
    %108 = tpu.matmul %107, %4, %cst_42 {dimension_numbers = #tpu.dot_dimension_numbers<[2], [1], [1], [2], [0, 0, 0, 1, 1, 2], [0], [0]>} : vector<8x1x8xf32>, vector<8x8x8xf32>, vector<8x1x8xf32> -> vector<8x1x8xf32>
    %109 = vector.shape_cast %108 : vector<8x1x8xf32> to vector<8x8xf32>
    %110 = arith.addf %106, %109 : vector<8x8xf32>
    %111 = vector.extract_strided_slice %22 {offsets = [16, 0], sizes = [8, 32], strides = [1, 1]} : vector<32x32xf32> to vector<8x32xf32>
    %cst_43 = arith.constant dense<0.000000e+00> : vector<8x32xf32>
    %112 = tpu.matmul %110, %111, %cst_43 {dimension_numbers = #tpu.dot_dimension_numbers<[1], [0], [0], [1], [0, 0, 1, 1], [], []>} : vector<8x8xf32>, vector<8x32xf32>, vector<8x32xf32> -> vector<8x32xf32>
    %113 = arith.addf %83, %112 : vector<8x32xf32>
    %114 = vector.extract_strided_slice %16 {offsets = [0, 24], sizes = [8, 8], strides = [1, 1]} : vector<8x96xf32> to vector<8x8xf32>
    %115 = vector.extract_strided_slice %16 {offsets = [0, 56], sizes = [8, 8], strides = [1, 1]} : vector<8x96xf32> to vector<8x8xf32>
    %116 = vector.extract_strided_slice %16 {offsets = [0, 88], sizes = [8, 8], strides = [1, 1]} : vector<8x96xf32> to vector<8x8xf32>
    %cst_44 = arith.constant dense<0.000000e+00> : vector<8x8xf32>
    %117 = tpu.matmul %114, %115, %cst_44 {dimension_numbers = #tpu.dot_dimension_numbers<[1], [1], [0], [0], [0, 0, 1, 0], [], []>} : vector<8x8xf32>, vector<8x8xf32>, vector<8x8xf32> -> vector<8x8xf32>
    %118 = vector.shape_cast %114 : vector<8x8xf32> to vector<8x1x8xf32>
    %cst_45 = arith.constant dense<0.000000e+00> : vector<8x1x8xf32>
    %119 = tpu.matmul %118, %4, %cst_45 {dimension_numbers = #tpu.dot_dimension_numbers<[2], [2], [1], [1], [0, 0, 0, 1, 1, 1], [0], [0]>} : vector<8x1x8xf32>, vector<8x8x8xf32>, vector<8x1x8xf32> -> vector<8x1x8xf32>
    %120 = vector.shape_cast %119 : vector<8x1x8xf32> to vector<8x8xf32>
    %121 = arith.addf %117, %120 : vector<8x8xf32>
    %cst_46 = arith.constant 0.353553385 : f32
    %122 = vector.broadcast %cst_46 : f32 to vector<8x8xf32>
    %123 = arith.mulf %121, %122 : vector<8x8xf32>
    %124 = vector.broadcast %21 : vector<1x8xf32> to vector<8x8xf32>
    %125 = arith.addf %123, %124 : vector<8x8xf32>
    %cst_47 = arith.constant dense<0xFF800000> : vector<8xf32>
    %126 = vector.multi_reduction <maximumf>, %125, %cst_47 [1] : vector<8x8xf32> to vector<8xf32>
    %127 = vector.shape_cast %126 : vector<8xf32> to vector<8x1xf32>
    %128 = vector.broadcast %127 : vector<8x1xf32> to vector<8x8xf32>
    %129 = arith.subf %125, %128 : vector<8x8xf32>
    %130 = math.exp %129 : vector<8x8xf32>
    %cst_48 = arith.constant dense<0.000000e+00> : vector<8xf32>
    %131 = vector.multi_reduction <add>, %130, %cst_48 [1] : vector<8x8xf32> to vector<8xf32>
    %132 = vector.shape_cast %131 : vector<8xf32> to vector<8x1xf32>
    %133 = tpu.reciprocal %132 {approx = true} : vector<8x1xf32> -> vector<8x1xf32>
    %134 = vector.broadcast %133 : vector<8x1xf32> to vector<8x8xf32>
    %135 = arith.mulf %130, %134 : vector<8x8xf32>
    %cst_49 = arith.constant dense<0.000000e+00> : vector<8x8xf32>
    %136 = tpu.matmul %135, %116, %cst_49 {dimension_numbers = #tpu.dot_dimension_numbers<[1], [0], [0], [1], [0, 0, 1, 1], [], []>} : vector<8x8xf32>, vector<8x8xf32>, vector<8x8xf32> -> vector<8x8xf32>
    %137 = vector.shape_cast %135 : vector<8x8xf32> to vector<8x1x8xf32>
    %cst_50 = arith.constant dense<0.000000e+00> : vector<8x1x8xf32>
    %138 = tpu.matmul %137, %4, %cst_50 {dimension_numbers = #tpu.dot_dimension_numbers<[2], [1], [1], [2], [0, 0, 0, 1, 1, 2], [0], [0]>} : vector<8x1x8xf32>, vector<8x8x8xf32>, vector<8x1x8xf32> -> vector<8x1x8xf32>
    %139 = vector.shape_cast %138 : vector<8x1x8xf32> to vector<8x8xf32>
    %140 = arith.addf %136, %139 : vector<8x8xf32>
    %141 = vector.extract_strided_slice %22 {offsets = [24, 0], sizes = [8, 32], strides = [1, 1]} : vector<32x32xf32> to vector<8x32xf32>
    %cst_51 = arith.constant dense<0.000000e+00> : vector<8x32xf32>
    %142 = tpu.matmul %140, %141, %cst_51 {dimension_numbers = #tpu.dot_dimension_numbers<[1], [0], [0], [1], [0, 0, 1, 1], [], []>} : vector<8x8xf32>, vector<8x32xf32>, vector<8x32xf32> -> vector<8x32xf32>
    %143 = arith.addf %113, %142 : vector<8x32xf32>
    %144 = vector.broadcast %6 : vector<1x32xf32> to vector<8x32xf32>
    %145 = arith.addf %143, %144 : vector<8x32xf32>
    %146 = arith.addf %1, %145 : vector<8x32xf32>
    %cst_52 = arith.constant dense<0.000000e+00> : vector<8xf32>
    %147 = vector.multi_reduction <add>, %146, %cst_52 [1] : vector<8x32xf32> to vector<8xf32>
    %148 = vector.shape_cast %147 : vector<8xf32> to vector<8x1xf32>
    %cst_53 = arith.constant 3.200000e+01 : f32
    %149 = vector.broadcast %cst_53 : f32 to vector<8x1xf32>
    %150 = arith.divf %148, %149 : vector<8x1xf32>
    %151 = vector.broadcast %150 : vector<8x1xf32> to vector<8x32xf32>
    %152 = arith.subf %146, %151 : vector<8x32xf32>
    %153 = arith.mulf %152, %152 : vector<8x32xf32>
    %cst_54 = arith.constant dense<0.000000e+00> : vector<8xf32>
    %154 = vector.multi_reduction <add>, %153, %cst_54 [1] : vector<8x32xf32> to vector<8xf32>
    %155 = vector.shape_cast %154 : vector<8xf32> to vector<8x1xf32>
    %cst_55 = arith.constant 3.200000e+01 : f32
    %156 = vector.broadcast %cst_55 : f32 to vector<8x1xf32>
    %157 = arith.divf %155, %156 : vector<8x1xf32>
    %158 = vector.broadcast %150 : vector<8x1xf32> to vector<8x32xf32>
    %159 = arith.subf %146, %158 : vector<8x32xf32>
    %cst_56 = arith.constant 9.99999974E-6 : f32
    %160 = vector.broadcast %cst_56 : f32 to vector<8x1xf32>
    %161 = arith.addf %157, %160 : vector<8x1xf32>
    %162 = math.rsqrt %161 : vector<8x1xf32>
    %163 = vector.broadcast %162 : vector<8x1xf32> to vector<8x32xf32>
    %164 = arith.mulf %159, %163 : vector<8x32xf32>
    %165 = vector.broadcast %7 : vector<1x32xf32> to vector<8x32xf32>
    %166 = arith.mulf %164, %165 : vector<8x32xf32>
    %167 = vector.broadcast %8 : vector<1x32xf32> to vector<8x32xf32>
    %168 = arith.addf %166, %167 : vector<8x32xf32>
    %c0_57 = arith.constant 0 : index
    %c0_58 = arith.constant 0 : index
    %169 = vector.load %arg7[%c0_57, %c0_58] : memref<32x64xf32, #tpu.memory_space<vmem>>, vector<32x64xf32>
    %cst_59 = arith.constant dense<0.000000e+00> : vector<8x64xf32>
    %170 = tpu.matmul %168, %169, %cst_59 {dimension_numbers = #tpu.dot_dimension_numbers<[1], [0], [0], [1], [0, 0, 1, 1], [], []>} : vector<8x32xf32>, vector<32x64xf32>, vector<8x64xf32> -> vector<8x64xf32>
    %c0_60 = arith.constant 0 : index
    %c0_61 = arith.constant 0 : index
    %171 = vector.load %arg8[%c0_60, %c0_61] : memref<1x64xf32, #tpu.memory_space<vmem>>, vector<1x64xf32>
    %172 = vector.broadcast %171 : vector<1x64xf32> to vector<8x64xf32>
    %173 = arith.addf %170, %172 : vector<8x64xf32>
    %cst_62 = arith.constant 0.000000e+00 : f32
    %174 = vector.broadcast %cst_62 : f32 to vector<8x64xf32>
    %175 = arith.maximumf %173, %174 : vector<8x64xf32>
    %c0_63 = arith.constant 0 : index
    %c0_64 = arith.constant 0 : index
    %176 = vector.load %arg9[%c0_63, %c0_64] : memref<64x32xf32, #tpu.memory_space<vmem>>, vector<64x32xf32>
    %cst_65 = arith.constant dense<0.000000e+00> : vector<8x32xf32>
    %177 = tpu.matmul %175, %176, %cst_65 {dimension_numbers = #tpu.dot_dimension_numbers<[1], [0], [0], [1], [0, 0, 1, 1], [], []>} : vector<8x64xf32>, vector<64x32xf32>, vector<8x32xf32> -> vector<8x32xf32>
    %178 = vector.broadcast %11 : vector<1x32xf32> to vector<8x32xf32>
    %179 = arith.addf %177, %178 : vector<8x32xf32>
    %180 = arith.addf %168, %179 : vector<8x32xf32>
    %cst_66 = arith.constant dense<0.000000e+00> : vector<8xf32>
    %181 = vector.multi_reduction <add>, %180, %cst_66 [1] : vector<8x32xf32> to vector<8xf32>
    %182 = vector.shape_cast %181 : vector<8xf32> to vector<8x1xf32>
    %cst_67 = arith.constant 3.200000e+01 : f32
    %183 = vector.broadcast %cst_67 : f32 to vector<8x1xf32>
    %184 = arith.divf %182, %183 : vector<8x1xf32>
    %185 = vector.broadcast %184 : vector<8x1xf32> to vector<8x32xf32>
    %186 = arith.subf %180, %185 : vector<8x32xf32>
    %187 = arith.mulf %186, %186 : vector<8x32xf32>
    %cst_68 = arith.constant dense<0.000000e+00> : vector<8xf32>
    %188 = vector.multi_reduction <add>, %187, %cst_68 [1] : vector<8x32xf32> to vector<8xf32>
    %189 = vector.shape_cast %188 : vector<8xf32> to vector<8x1xf32>
    %cst_69 = arith.constant 3.200000e+01 : f32
    %190 = vector.broadcast %cst_69 : f32 to vector<8x1xf32>
    %191 = arith.divf %189, %190 : vector<8x1xf32>
    %192 = vector.broadcast %184 : vector<8x1xf32> to vector<8x32xf32>
    %193 = arith.subf %180, %192 : vector<8x32xf32>
    %cst_70 = arith.constant 9.99999974E-6 : f32
    %194 = vector.broadcast %cst_70 : f32 to vector<8x1xf32>
    %195 = arith.addf %191, %194 : vector<8x1xf32>
    %196 = math.rsqrt %195 : vector<8x1xf32>
    %197 = vector.broadcast %196 : vector<8x1xf32> to vector<8x32xf32>
    %198 = arith.mulf %193, %197 : vector<8x32xf32>
    %199 = vector.broadcast %9 : vector<1x32xf32> to vector<8x32xf32>
    %200 = arith.mulf %198, %199 : vector<8x32xf32>
    %201 = vector.broadcast %10 : vector<1x32xf32> to vector<8x32xf32>
    %202 = arith.addf %200, %201 : vector<8x32xf32>
    %c0_71 = arith.constant 0 : index
    %c0_72 = arith.constant 0 : index
    %c0_73 = arith.constant 0 : index
    %203 = vector.load %arg11[%c0_71, %c0_72, %c0_73] : memref<1x8x32xf32, #tpu.memory_space<vmem>>, vector<1x8x32xf32>
    %204 = vector.shape_cast %203 : vector<1x8x32xf32> to vector<8x32xf32>
    %205 = vector.shape_cast %202 : vector<8x32xf32> to vector<1x8x32xf32>
    tpu.vector_store %arg11[%c0_71, %c0_72, %c0_73], %205 {strides = array<i32>} : memref<1x8x32xf32, #tpu.memory_space<vmem>>, vector<1x8x32xf32>,
    return
  }
  func.func @transform_0(%arg0: i32) -> (i32, i32, i32) {
    %c0_i32 = arith.constant 0 : i32
    %c0_i32_0 = arith.constant 0 : i32
    %c0_i32_1 = arith.constant 0 : i32
    return %arg0, %c0_i32, %c0_i32_0 : i32, i32, i32
  }
  func.func @transform_1(%arg0: i32) -> (i32, i32, i32) {
    %c0_i32 = arith.constant 0 : i32
    %c0_i32_0 = arith.constant 0 : i32
    %c0_i32_1 = arith.constant 0 : i32
    return %arg0, %c0_i32, %c0_i32_0 : i32, i32, i32
  }
  func.func @transform_2(%arg0: i32) -> (i32, i32, i32) {
    %c0_i32 = arith.constant 0 : i32
    %c0_i32_0 = arith.constant 0 : i32
    %c0_i32_1 = arith.constant 0 : i32
    %c0_i32_2 = arith.constant 0 : i32
    return %c0_i32, %c0_i32_0, %c0_i32_1 : i32, i32, i32
  }
  func.func @transform_3(%arg0: i32) -> (i32, i32) {
    %c0_i32 = arith.constant 0 : i32
    %c0_i32_0 = arith.constant 0 : i32
    %c0_i32_1 = arith.constant 0 : i32
    return %c0_i32, %c0_i32_0 : i32, i32
  }
  func.func @transform_4(%arg0: i32) -> (i32, i32) {
    %c0_i32 = arith.constant 0 : i32
    %c0_i32_0 = arith.constant 0 : i32
    %c0_i32_1 = arith.constant 0 : i32
    return %c0_i32, %c0_i32_0 : i32, i32
  }
  func.func @transform_5(%arg0: i32) -> (i32, i32) {
    %c0_i32 = arith.constant 0 : i32
    %c0_i32_0 = arith.constant 0 : i32
    %c0_i32_1 = arith.constant 0 : i32
    return %c0_i32, %c0_i32_0 : i32, i32
  }
  func.func @transform_6(%arg0: i32) -> (i32, i32) {
    %c0_i32 = arith.constant 0 : i32
    %c0_i32_0 = arith.constant 0 : i32
    %c0_i32_1 = arith.constant 0 : i32
    return %c0_i32, %c0_i32_0 : i32, i32
  }
  func.func @transform_7(%arg0: i32) -> (i32, i32) {
    %c0_i32 = arith.constant 0 : i32
    %c0_i32_0 = arith.constant 0 : i32
    %c0_i32_1 = arith.constant 0 : i32
    return %c0_i32, %c0_i32_0 : i32, i32
  }
  func.func @transform_8(%arg0: i32) -> (i32, i32) {
    %c0_i32 = arith.constant 0 : i32
    %c0_i32_0 = arith.constant 0 : i32
    %c0_i32_1 = arith.constant 0 : i32
    return %c0_i32, %c0_i32_0 : i32, i32
  }
  func.func @transform_9(%arg0: i32) -> (i32, i32) {
    %c0_i32 = arith.constant 0 : i32
    %c0_i32_0 = arith.constant 0 : i32
    %c0_i32_1 = arith.constant 0 : i32
    return %c0_i32, %c0_i32_0 : i32, i32
  }
  func.func @transform_10(%arg0: i32) -> (i32, i32, i32) {
    %c0_i32 = arith.constant 0 : i32
    %c0_i32_0 = arith.constant 0 : i32
    %c0_i32_1 = arith.constant 0 : i32
    return %arg0, %c0_i32, %c0_i32_0 : i32, i32, i32
  }
}

</mosaic_0001>

<bundles_post_ra>
// kernel: tpu_custom_call.1
= control target key start
LH: loop header
LB: loop body
LE: loop exit
PB: predicated region body
PF: predicated region fallthrough
CT: control target
= control target key end

     0   :  { %15 = vsyncpa [#allocation3], 0  ;;  %s9109_s0 = inlined_call_operand.hbm [shape: f32[2,8,32], index: 0, kind: input, shape index: {}]   ;;  %s9110_s1 = inlined_call_operand.vmem [shape: f32[2,1,8], index: 1, kind: input, shape index: {}]   ;;  %s9111_s2 = inlined_call_operand.vmem [shape: f32[8,8,8], index: 2, kind: input, shape index: {}]   ;;  %s9112_s3 = inlined_call_operand.vmem [shape: f32[32,96], index: 3, kind: input, shape index: {}]   ;;  %s9113_s4 = inlined_call_operand.vmem [shape: f32[1,96], index: 4, kind: input, shape index: {}]   ;;  %s9114_s5 = inlined_call_operand.hbm [shape: f32[32,32], index: 5, kind: input, shape index: {}]   ;;  %s9115_s6 = inlined_call_operand.hbm [shape: f32[32,64], index: 6, kind: input, shape index: {}]   ;;  %s9116_s7 = inlined_call_operand.vmem [shape: f32[1,64], index: 7, kind: input, shape index: {}]   ;;  %s9117_s8 = inlined_call_operand.vmem [shape: f32[64,32], index: 8, kind: input, shape index: {}]   ;;  %s9118_s9 = inlined_call_operand.vmem [shape: f32[6,32], index: 9, kind: input, shape index: {}]   ;;  %s9119_s10 = inlined_call_operand.hbm [shape: f32[2,8,32], index: 10, kind: output, shape index: {}]  }
   0x1   :  { %17 = vsyncpa [#allocation3 + $0x1], 0 }
   0x2   :  { %18 = vsyncpa [#allocation6], 0 }
   0x3   :  { %19 = vsyncpa [#allocation4], 0 }
   0x4   :  { %21 = vsyncpa [#allocation4 + $0x1], 0  ;;  %s8072_s13 = smov 0   ;;  %s8074_s14 = smov 0  }
   0x5   :  { %s8076_s15 = smov 0   ;;  %s8078_s16 = smov 0  }
   0x6 LB: > { %9125 = sst [smem:[#allocation12_spill]] %s7981_s13  ;;  %s8093_s17 = sadd.s32 4294967295, %s7993_s16   ;;  %s7993_s16 = sphi %s8078_s16, %s9145_s16   ;;  %s7989_s15 = sphi %s8076_s15, %s9144_s15   ;;  %s7985_s14 = sphi %s8074_s14, %s9143_s14   ;;  %s7981_s13 = sphi %s8072_s13, %s9142_s13  }
   0x7   : > { %s6974_s18 = sadd.s32 4294967294, %s7993_s16   ;;  %p47_p0 = scmp.ne.s32.totalorder %s7985_s14, %s7981_s13 }
   0x8   : > { %p9120_p1 = scmp.eq.s32.totalorder %s8093_s17, 0  ;;  %p271_p3 = scmp.eq.s32.totalorder %s6974_s18, 1 }
   0x9   : > { %p6975_p5 = scmp.ge.s32.totalorder %s7993_s16, 1  ;;  %p278_p7 = scmp.lt.s32.totalorder %s7993_s16, 3 }
   0xa   : > { %p8102_p4 = por %p9120_p1, %p47_p0  ;;  %p8107_p6 = por %p271_p3, %p47_p0 }
   0xb   : > { %p8112_p8 = pnand %p6975_p5, %p278_p7  ;;  %s7995_s22 = smov [#allocation5]  }
   0xc   : > { %s9126_s19 = scalar_select %p8102_p4, 1, 0 }
   0xd   : > { %s9127_s20 = scalar_select %p8107_p6, 1, 0 }
   0xe   : > { %s299_s23 = sshll.u32 %s7995_s22, 4  ;;  %p7735_p9 = pneg %p8112_p8  ;;  %s8116_s23 = int_to_ptr.vmem [resolvable:$true] %s299_s23 }
   0xf   : > { %9128 = sst [smem:[#allocation13_spill]] %s9127_s20  ;;  %s7996_s25 = smov [#allocation7]  }
  0x10   : > { %p8123_p11 = pnand %p7735_p9, %p9120_p1  ;;  %s312_s26 = sshll.u32 %s7996_s25, 4  ;;  %s8127_s26 = int_to_ptr.vmem [resolvable:$true] %s312_s26 }
  0x11   : > { %s7837_s29 = scalar_lea.hbm %s9114_s5, 512 }
  0x12   : > { %p7838_p12 = scmp.ne.s32.totalorder %s9114_s5, %s7837_s29  ;;  %p7839_p13 = pneg %p8123_p11 }
  0x13   : > { %p7844_p5 = scmp.lt.u32.totalorder %s7837_s29, %s9114_s5 }
  0x14   : > { %p7840_p0 = pnand %p7839_p13, %p7838_p12 }
  0x16   : > { %p7841_p3 = pneg %p7840_p0 }
  0x18   : > { %p7846_p7 = pnand %p7844_p5, %p7841_p3 }
  0x1a   : > { %7849 = shalt.err (!%p7846_p7)
}
  0x1b   : > { %s7850_s22 = scalar_lea.vmem %s8116_s23, 512  ;;  %p7858_p2 = scmp.lt.s32.totalorder %s8116_s23, %s8116_s23 }
  0x1c   : > { %p7851_p9 = scmp.ne.s32.totalorder %s8116_s23, %s7850_s22  ;;  %p7859_p12 = scmp.lt.s32.totalorder %s7850_s22, %s7850_s22 }
  0x1e   : > { %p7853_p10 = pnand %p7851_p9, %p7839_p13  ;;  %p7860_p0 = por %p7859_p12, %p7858_p2 }
  0x20   : > { %p7854_p1 = pneg %p7853_p10 }
  0x22   : > { %p7861_p6 = pnand %p7860_p0, %p7854_p1 }
  0x24   : > { %7864 = shalt.err (!%p7861_p6)
}
  0x25   : > { %s7997_s25 = smov 128   ;;  %s7998_s27 = smov 8  }
  0x26   : > { %7738 = dma.hbm_to_vmem [thread:$0]  (!%p8123_p11), %s9114_s5, 512, %s8116_s23, [#allocation6], %s7997_s25, %s7997_s25, %s7998_s27  }
  0x27   : > { %s7865_s12 = scalar_lea.hbm %s9115_s6, 512 }
  0x28   : > { %p7866_p2 = scmp.ne.s32.totalorder %s9115_s6, %s7865_s12  ;;  %p7872_p10 = scmp.lt.u32.totalorder %s7865_s12, %s9115_s6 }
  0x2a   : > { %p7868_p1 = pnand %p7866_p2, %p7839_p13 }
  0x2c   : > { %p7869_p6 = pneg %p7868_p1 }
  0x2e   : > { %p7874_p3 = pnand %p7872_p10, %p7869_p6 }
  0x30   : > { %7877 = shalt.err (!%p7874_p3)
}
  0x31   : > { %s7878_s23 = scalar_lea.vmem %s8127_s26, 512  ;;  %p7886_p12 = scmp.lt.s32.totalorder %s8127_s26, %s8127_s26 }
  0x32   : > { %p7879_p5 = scmp.ne.s32.totalorder %s8127_s26, %s7878_s23  ;;  %p7887_p0 = scmp.lt.s32.totalorder %s7878_s23, %s7878_s23 }
  0x34   : > { %p7881_p7 = pnand %p7879_p5, %p7839_p13  ;;  %p7888_p2 = por %p7887_p0, %p7886_p12 }
  0x36   : > { %p7882_p9 = pneg %p7881_p7 }
  0x38   : > { %p7889_p1 = pnand %p7888_p2, %p7882_p9 }
  0x3a   : > { %7892 = shalt.err (!%p7889_p1)
}
  0x3b   : > { %7741 = dma.hbm_to_vmem [thread:$0]  (!%p8123_p11), %s9115_s6, 512, %s8127_s26, [#allocation6], %s7997_s25, %s7997_s25, %s7998_s27  }
  0x3c   : > { %s8182_s28 = sadd.s32 1, %s7993_s16   ;;  %s34_s24 = sadd.s32 1, %s7989_s15 }
  0x3d   : > { %s31_s29 = ssub.s32 %s7993_s16, %s8182_s28  ;;  %p41_p13 = scmp.ne.s32.totalorder %s7989_s15, %s7985_s14 }
  0x3e   : > { %p32_p6 = scmp.eq.s32.totalorder %s31_s29, 0  ;;  %p42_p10 = scmp.eq.s32.totalorder %s7993_s16, 0 }
  0x3f   : > { %p9131_p3 = scmp.eq.s32.totalorder %s8093_s17, 1  ;;  %p7752_p7 = scmp.lt.s32.totalorder %s7993_s16, 2 }
  0x40   : > { %s8198_s11 = scalar_select %p32_p6, %s7989_s15, %s34_s24  }
  0x41   : > { %p8192_p5 = por %p9131_p3, %p41_p13  ;;  %p43_p9 = por %p42_p10, %p41_p13 }
  0x42   : > { %s335_s12 = sand.u32 1, %s7989_s15   ;;  %s6980_s26 = sshll.u32 %s7993_s16, 7 }
  0x43   : > { %s9132_s30 = scalar_select %p8192_p5, 1, 0 }
  0x44   : > { %s6979_s18 = sshll.u32 %s335_s12, 3  ;;  %s8205_s22 = scalar_lea.hbm %s9109_s0, %s6980_s26 }
  0x45   : > { %s339_s23 = scalar_lea.vmem [#allocation2], %s6979_s18  ;;  %p8209_p11 = pnand %p7752_p7, %p43_p9 }
  0x46   : > { %s346_s13 = sshll.u32 %s339_s23, 4  ;;  %s336_s24 = scalar_lea.sflag [#allocation3], %s335_s12  ;;  %s8207_s13 = int_to_ptr.vmem [resolvable:$true] %s346_s13 }
  0x47   : > { %s7893_s29 = scalar_lea.hbm %s8205_s22, 128  ;;  %p7895_p0 = pneg %p8209_p11 }
  0x48   : > { %p7894_p12 = scmp.ne.s32.totalorder %s8205_s22, %s7893_s29  ;;  %s7898_s25 = scalar_lea.hbm %s9109_s0, 256 }
  0x49   : > { %p7899_p13 = scmp.lt.u32.totalorder %s8205_s22, %s9109_s0  ;;  %p7900_p6 = scmp.lt.u32.totalorder %s7898_s25, %s7893_s29 }
  0x4a   : > { %p7896_p2 = pnand %p7895_p0, %p7894_p12  ;;  %p7902_p3 = scmp.lt.u32.totalorder %s7893_s29, %s8205_s22 }
  0x4b   : > { %p7901_p10 = por %p7900_p6, %p7899_p13 }
  0x4c   : > { %p7897_p1 = pneg %p7896_p2 }
  0x4d   : > { %p7903_p7 = por %p7902_p3, %p7901_p10 }
  0x4f   : > { %p7904_p9 = pnand %p7903_p7, %p7897_p1 }
  0x51   : > { %7907 = shalt.err (!%p7904_p9)
}
  0x52   : > { %s7908_s12 = scalar_lea.vmem %s8207_s13, 128  ;;  %s7999_s26 = smov [#allocation2]  }
  0x53   : > { %p7909_p12 = scmp.ne.s32.totalorder %s8207_s13, %s7908_s12  ;;  %s7913_s18 = sshll.u32 %s7999_s26, 4  ;;  %s7914_s18 = int_to_ptr.vmem [resolvable:$false] %s7913_s18 }
  0x54   : > { %s7915_s27 = scalar_lea.vmem %s7914_s18, 256  ;;  %p7916_p4 = scmp.lt.s32.totalorder %s8207_s13, %s7914_s18 }
  0x55   : > { %p7911_p2 = pnand %p7909_p12, %p7895_p0  ;;  %p7917_p13 = scmp.lt.s32.totalorder %s7915_s27, %s7908_s12 }
  0x57   : > { %p7912_p5 = pneg %p7911_p2  ;;  %p7918_p6 = por %p7917_p13, %p7916_p4 }
  0x59   : > { %p7919_p10 = pnand %p7918_p6, %p7912_p5 }
  0x5b   : > { %7922 = shalt.err (!%p7919_p10)
}
  0x5c   : > { %7745 = dma.hbm_to_vmem [thread:$0]  (!%p8209_p11), %s8205_s22, 128, %s8207_s13, %s336_s24  }
  0x5d   : > { %361 = sbr.rel (%p8112_p8) target bundleno = 4650 (0x122a), region = 60  ;;  %s8241_s29 = sand.u32 (!%p8112_p8), 1, %s7985_s14  }
  0x5e   : > { %s6982_s25 = sshll.u32 (!%p8112_p8), %s8241_s29, 3  ;;  %s364_s23 = scalar_lea.sflag (!%p8112_p8), [#allocation3], %s8241_s29 }
  0x5f   : > { %s8247_s12 = scalar_lea.vmem (!%p8112_p8), [#allocation2], %s6982_s25  ;;  %p9134_p4 = scmp.ne.s32.totalorder (!%p8112_p8), %s9126_s19, 0 }
  0x64   : > { %7968 = dma.done.wait (%p9134_p4), %s364_s23, 128  }
  0x65   : > { %7970 = vsyncadd (%p9134_p4), %s364_s23, 4294967168  ;;  %p9135_p5 = scmp.eq.s32.totalorder %s8093_s17, 0 }
  0x67   : > { %7972 = dma.done.wait (%p9135_p5), [#allocation6], 1024   ;;  %p9136_p8 = pmov %p9135_p5 }
  0x68   : > { %v8000_v0 = vmov 0.0|0.0   ;;  %vm8001_vm0 = vmmov 0   ;;  %v8002_v1 = vmov 0.0   ;;  %v429_v2 = vld [vmem:[%s9112_s3] sm:$0xff]  ;;  %v430_v3 = vld [vmem:[%s9112_s3 + $0x8] sm:$0xff]  ;;  %v431_v4 = vld [vmem:[%s9112_s3 + $0x10] sm:$0xff]  ;;  %v525_v13 = vlaneseq }
  0x69   : > { %7974 = vsyncadd (%p9136_p8), [#allocation6], 4294966272  ;;  %7699 = vmatprep.subr.bf16.mxu0 %v8000_v0  ;;  %7286 = vmatprep.mubr.msk.f32.mxu0 %vm8001_vm0, %v8002_v1  ;;  %v7700_v5 = vpack.c.bf16 %v430_v3, %v429_v2  ;;  %v432_v6 = vld [vmem:[%s9112_s3 + $0x18] sm:$0xff]  ;;  %v418_v8 = vld [vmem:[%s8247_s12] sm:$0xff]  ;;  %vm440_vm1 = vcmask 261120   ;;  %vm570_vm2 = vcmask 64512  }
  0x6a   : > { %7294 = vmatprep.subr.mxu1 %v8002_v1  ;;  %7296 = vmatprep.mubr.msk.f32.mxu1 %vm8001_vm0, %v8002_v1  ;;  %v7703_v7 = vpack.c.bf16 %v432_v6, %v431_v4  ;;  %v8284_v9 = vld [vmem:[%s9111_s2] sm:$0xff]  ;;  %v8289_v10 = vld [vmem:[%s9111_s2 + $0x8] sm:$0xff]  ;;  %v8003_v11 = vmov 1966171168   ;;  %v8297_v15 = vshrl.u32 %v525_v13, 7  ;;  %s8004_s20 = smov 64  }
  0x6b   : > { %7701 = vmatpush3.bf16.msra.mxu0 %v7700_v5  ;;  %7295 = vmatpush3.xpose.msk.msra.mxu1 %vm570_vm2, %v8289_v10  ;;  %v523_v12 = vunpack.c.l.s4 %v8003_v11  ;;  %v6986_v16 = vld [vmem:[%s9113_s4] ss:$0 sm:$0xff]  ;;  %s8005_s24 = smov 96   ;;  %v8319_v24 = vld [vmem:[%s9111_s2 + $0x10] sm:$0xff]  ;;  %v8329_v27 = vld [vmem:[%s9111_s2 + $0x18] sm:$0xff]  ;;  %vm1182_vm3 = vcmask 1041409  }
  0x6c   : > { %7702 = vmatprep.subr.bf16.mxu0 %v8000_v0  ;;  %7304 = vmatprep.subr.mxu1 %v8002_v1  ;;  %v8346_v30 = vld [vmem:[%s9111_s2 + $0x20] sm:$0xff]  ;;  %v8362_v32 = vld [vmem:[%s9111_s2 + $0x28] sm:$0xff]  ;;  %v8377_v35 = vld [vmem:[%s9111_s2 + $0x30] sm:$0xff]  ;;  %vm1185_vm4 = vcmask 1042434   ;;  %vm1188_vm5 = vcmask 1043459   ;;  %vm1191_vm6 = vcmask 1044484  }
  0x6d   : > { %v524_v14 = vunpack.c.0.s8 %v523_v12  ;;  %v8392_v37 = vld [vmem:[%s9111_s2 + $0x38] sm:$0xff]  ;;  %vm1194_vm7 = vcmask 1045509   ;;  %vm1197_vm8 = vcmask 1046534   ;;  %vm1200_vm9 = vcmask 1047559   ;;  %p415_p11 = scmp.lt.s32.totalorder %s8093_s17, 1  ;;  %s8007_s22 = smov 120  }
  0x6e   : > { %v8006_v12 = vmov -1e+10   ;;  %s8008_s13 = smov 88   ;;  %s8011_s26 = smov 80   ;;  %vm6763_vm11 = vcmask 523264  }
  0x6f   : > { %7704 = vmatpush3.bf16.msra.mxu0 %v7703_v7  ;;  %v8303_v17 = vsub.s32 %v524_v14, %v8297_v15  ;;  %s416_s27 = scalar_select %p415_p11, %s8093_s17, 1  ;;  %v8445_v14 = vsub.s32 0, %v8297_v15 }
  0x70   : > { %7289 = vmatprep.subr.mxu0 %v8002_v1  ;;  %s8012_s18 = smov 104   ;;  %s8014_s23 = smov 72  }
  0x71   : > { %s417_s21 = scalar_lea.vmem %s9110_s1, %s416_s27  ;;  %s8013_s27 = smov 48  }
  0x72   : > { %7287 = vmatmul.mubr.msk.f32.vlgmr.msra.gmra.mrb[0].mxu0 %vm440_vm1, %v418_v8  ;;  %v419_v11 = vld [vmem:[%s417_s21] sm:$0x1]  ;;  %s6863_s19 = scalar_lea.sflag [#allocation4], %s8241_s29  ;;  %p9137_p1 = scmp.ne.s32.totalorder %s9132_s30, 0 }
  0x73   : > { %7291 = vmatprep.mubr.msk.f32.mxu0 %vm8001_vm0, %v8002_v1  ;;  %vm514_vm10 = vcmp.gt.f32.partialorder %v419_v11, 0.0 }
  0x74   : > { %v515_v13 = vsel %vm514_vm10, 0.0, %v8006_v12 }
  0x78   : > { %7290 = vmatpush3.xpose.msk.msra.mxu0 %vm570_vm2, %v8284_v9 }
  0x79   : > { %7299 = vmatprep.subr.mxu0 %v8002_v1 }
 0x145   : > { %v510_v18 = vpop.f32.mrb[0].mxu0 }
 0x146   : > { %v8305_v19 = vadd.f32 %v6986_v16, %v510_v18  ;;  %v7288_v20 = vpop.f32.mrb[1].mxu0 }
 0x148   : > { %1922 = vrot.lane.b32.xlu1 %v8305_v19, %s8004_s20  ;;  %1171 = vrot.lane.b32.xlu0 %v8305_v19, %s8005_s24  ;;  %v528_v21 = vrot.slane %v8305_v19, %v8303_v17  ;;  %v521_v22 = vcombine.high %v8305_v19, %v8305_v19  ;;  %s8009_s20 = smov 56   ;;  %s8010_s24 = smov 112  }
 0x14a   : > { %v8314_v23 = vrot.slane %v528_v21, %v8303_v17  ;;  %v536_v25 = vcombine.high %v528_v21, %v528_v21  ;;  %v535_v28 = vrot.slane %v521_v22, %v8303_v17  ;;  %v8448_v21 = vrot.slane %v515_v13, %v8445_v14 }
 0x14c   : > { %7292 = vmatmul.mubr.msk.f32.vlgmr.msra.gmra.mrb[2].mxu0 %vm570_vm2, %v8314_v23  ;;  %v8324_v26 = vrot.slane %v536_v25, %v8303_v17  ;;  %v8340_v29 = vcombine.high %v8314_v23, %v8314_v23  ;;  %v537_v33 = vcombine.high %v535_v28, %v535_v28  ;;  %v8371_v34 = vrot.slane %v535_v28, %v8303_v17 }
 0x14d   : > { %7300 = vmatpush3.xpose.msk.msra.mxu0 %vm570_vm2, %v8319_v24  ;;  %7301 = vmatprep.mubr.msk.f32.mxu0 %vm8001_vm0, %v8002_v1 }
 0x14e   : > { %7297 = vmatmul.mubr.msk.f32.vlgmr.msra.gmra.mrb[0].mxu1 %vm570_vm2, %v8324_v26  ;;  %7309 = vmatprep.subr.mxu0 %v8002_v1  ;;  %v8356_v31 = vcombine.high %v8324_v26, %v8324_v26  ;;  %v8386_v36 = vrot.slane %v537_v33, %v8303_v17  ;;  %v8402_v38 = vcombine.high %v8371_v34, %v8371_v34 }
 0x14f   : > { %7305 = vmatpush3.xpose.msk.msra.mxu1 %vm570_vm2, %v8329_v27  ;;  %7306 = vmatprep.mubr.msk.f32.mxu1 %vm8001_vm0, %v8002_v1  ;;  %v8454_v33 = vrot.slane %v8371_v34, %v8445_v14 }
 0x150   : > { %7302 = vmatmul.mubr.msk.f32.vlgmr.msra.gmra.mrb[4].mxu0 %vm570_vm2, %v8340_v29  ;;  %7314 = vmatprep.subr.mxu1 %v8002_v1  ;;  %v8413_v39 = vcombine.high %v8386_v36, %v8386_v36 }
 0x151   : > { %7310 = vmatpush3.xpose.msk.msra.mxu0 %vm570_vm2, %v8346_v30  ;;  %7311 = vmatprep.mubr.msk.f32.mxu0 %vm8001_vm0, %v8002_v1 }
 0x152   : > { %7307 = vmatmul.mubr.msk.f32.vlgmr.msra.gmra.mrb[2].mxu1 %vm570_vm2, %v8356_v31  ;;  %7319 = vmatprep.subr.mxu0 %v8002_v1 }
 0x153   : > { %7315 = vmatpush3.xpose.msk.msra.mxu1 %vm570_vm2, %v8362_v32  ;;  %7316 = vmatprep.mubr.msk.f32.mxu1 %vm8001_vm0, %v8002_v1 }
 0x154   : > { %7312 = vmatmul.mubr.msk.f32.vlgmr.msra.gmra.mrb[6].mxu0 %vm570_vm2, %v8371_v34  ;;  %7324 = vmatprep.subr.mxu1 %v8002_v1  ;;  %v8465_v34 = vrot.slane %v8324_v26, %v8445_v14  ;;  %v8485_v26 = vrot.slane %v8402_v38, %v8445_v14 }
 0x155   : > { %7320 = vmatpush3.xpose.msk.msra.mxu0 %vm570_vm2, %v8377_v35  ;;  %7321 = vmatprep.mubr.msk.f32.mxu0 %vm8001_vm0, %v8002_v1 }
 0x156   : > { %7317 = vmatmul.mubr.msk.f32.vlgmr.msra.gmra.mrb[4].mxu1 %vm570_vm2, %v8386_v36  ;;  %7329 = vmatprep.subr.mxu0 %v8002_v1 }
 0x157   : > { %7325 = vmatpush3.xpose.msk.msra.mxu1 %vm570_vm2, %v8392_v37  ;;  %7326 = vmatprep.mubr.msk.f32.mxu1 %vm8001_vm0, %v8002_v1 }
 0x158   : > { %7322 = vmatmul.mubr.msk.f32.vlgmr.msra.gmra.mrb[8].mxu0 %vm570_vm2, %v8402_v38  ;;  %7334 = vmatprep.subr.mxu1 %v8002_v1 }
 0x159   : > { %7331 = vmatprep.mubr.msk.f32.mxu0 %vm8001_vm0, %v8002_v1 }
 0x15a   : > { %7327 = vmatmul.mubr.msk.f32.vlgmr.msra.gmra.mrb[6].mxu1 %vm570_vm2, %v8413_v39 }
 0x15b   : > { %7335 = vmatpush3.msra.mxu1 %v8284_v9  ;;  %7336 = vmatprep.mubr.msk.f32.mxu1 %vm8001_vm0, %v8002_v1 }
 0x15c   : > { %7344 = vmatprep.subr.mxu1 %v8002_v1 }
 0x1ba   : > { %v1172_v40 = vpop.permute.xlu0 %1171 }
 0x1bb   : > { %7330 = vmatpush3.xpose.msk.msra.mxu0 %vm570_vm2, %v1172_v40 }
 0x1bc   : > { %7339 = vmatprep.subr.mxu0 %v8002_v1 }
 0x1be   : > { %7332 = vmatmul.mubr.msk.f32.vlgmr.msra.gmra.mrb[10].mxu0 %vm570_vm2, %v8305_v19 }
 0x1bf   : > { %7340 = vmatpush3.msra.mxu0 %v8289_v10  ;;  %7341 = vmatprep.mubr.msk.f32.mxu0 %vm8001_vm0, %v8002_v1 }
 0x1c0   : > { %7349 = vmatprep.subr.mxu0 %v8002_v1 }
 0x21f   : > { %v642_v41 = vpop.f32.mrb[2].mxu0 }
 0x220   : > { %v7293_v42 = vpop.f32.mrb[3].mxu0 }
 0x221   : > { %v717_v43 = vpop.f32.mrb[0].mxu1 }
 0x222   : > { %v1181_v44 = vrot.slane %v717_v43, 7  ;;  %v7298_v45 = vpop.f32.mrb[1].mxu1 }
 0x223   : > { %v792_v46 = vpop.f32.mrb[4].mxu0  ;;  %v8460_v45 = vrot.slane %v8314_v23, %v8445_v14  ;;  %v8480_v23 = vrot.slane %v8386_v36, %v8445_v14 }
 0x224   : > { %v1183_v47 = vsel %vm1182_vm3, %v1181_v44, %v642_v41  ;;  %v1184_v48 = vrot.slane %v792_v46, 6  ;;  %v7303_v49 = vpop.f32.mrb[5].mxu0  ;;  %v8470_v46 = vrot.slane %v8340_v29, %v8445_v14  ;;  %v8490_v29 = vrot.slane %v8413_v39, %v8445_v14 }
 0x225   : > { %v867_v50 = vpop.f32.mrb[2].mxu1 }
 0x226   : > { %v1186_v51 = vsel %vm1185_vm4, %v1184_v48, %v1183_v47  ;;  %v1187_v52 = vrot.slane %v867_v50, 5  ;;  %v7308_v53 = vpop.f32.mrb[3].mxu1  ;;  %v8475_v47 = vrot.slane %v8356_v31, %v8445_v14  ;;  %v1923_v31 = vpop.permute.xlu1 %1922 }
 0x227   : > { %v942_v54 = vpop.f32.mrb[6].mxu0 }
 0x228   : > { %v1189_v55 = vsel %vm1188_vm5, %v1187_v52, %v1186_v51  ;;  %v1190_v56 = vrot.slane %v942_v54, 4  ;;  %v7313_v57 = vpop.f32.mrb[7].mxu0 }
 0x229   : > { %v1017_v58 = vpop.f32.mrb[4].mxu1 }
 0x22a   : > { %v1192_v59 = vsel %vm1191_vm6, %v1190_v56, %v1189_v55  ;;  %v1193_v60 = vrot.slane %v1017_v58, 3  ;;  %v7318_v61 = vpop.f32.mrb[5].mxu1 }
 0x22b   : > { %v1092_v62 = vpop.f32.mrb[8].mxu0 }
 0x22c   : > { %v1195_v63 = vsel %vm1194_vm7, %v1193_v60, %v1192_v59  ;;  %v1196_v2 = vrot.slane %v1092_v62, 2  ;;  %v7323_v3 = vpop.f32.mrb[9].mxu0 }
 0x22d   : > { %v1167_v4 = vpop.f32.mrb[6].mxu1 }
 0x22e   : > { %v1199_v5 = vrot.slane %v1167_v4, 1  ;;  %v7328_v6 = vpop.f32.mrb[7].mxu1  ;;  %v1198_v7 = vsel %vm1197_vm8, %v1196_v2, %v1195_v63 }
 0x230   : > { %v1201_v8 = vsel %vm1200_vm9, %v1199_v5, %v1198_v7 }
 0x291   : > { %v1273_v16 = vpop.f32.mrb[10].mxu0 }
 0x292   : > { %v1274_v18 = vadd.f32 %v1273_v16, %v1201_v8  ;;  %v7333_v20 = vpop.f32.mrb[11].mxu0 }
 0x294   : > { %v1277_v22 = vmul.f32 0.35355338, %v1274_v18 }
 0x296   : > { %v1284_v25 = vadd.f32 %v8448_v21, %v1277_v22 }
 0x298   : > { %v1285_v28 = vsel %vm570_vm2, %v1284_v25, -inf }
 0x299   : > { %1286 = vmax.xlane.f32.xlu0 %v1285_v28 }
 0x2af   : > { %2336 = vrot.lane.b32.xlu0 %v8454_v33, %s8007_s22 }
 0x326   : > { %v1287_v40 = vpop.xlane.xlu0 %1286 }
 0x327   : > { %v1288_v41 = vsub.f32 %v1284_v25, %v1287_v40 }
 0x329   : > { %v1289_v42 = vmul.f32 1.442695, %v1288_v41 }
 0x32a   : > { %v2337_v6 = vpop.permute.xlu0 %2336 }
 0x32b   : > { %7808 = vpow2.f32 %v1289_v42 }
 0x335   : > { %v7809_v43 = vpop.eup %7808 }
 0x336   : > { %v1291_v44 = vsel %vm570_vm2, %v7809_v43, 0.0 }
 0x337   : > { %1292 = vadd.xlane.f32.xlu1 %v1291_v44 }
 0x348   : > { %2024 = vrot.lane.b32.xlu1 %v8460_v45, %s8007_s22 }
 0x34c   : > { %2102 = vrot.lane.b32.xlu1 %v8465_v34, %s8007_s22 }
 0x350   : > { %2180 = vrot.lane.b32.xlu1 %v8470_v46, %s8007_s22 }
 0x354   : > { %2258 = vrot.lane.b32.xlu1 %v8475_v47, %s8007_s22 }
 0x358   : > { %2414 = vrot.lane.b32.xlu1 %v8480_v23, %s8007_s22 }
 0x35c   : > { %2492 = vrot.lane.b32.xlu1 %v8485_v26, %s8007_s22 }
 0x360   : > { %2570 = vrot.lane.b32.xlu1 %v8490_v29, %s8007_s22 }
 0x364   : > { %2646 = vrot.lane.b32.xlu1 %v8305_v19, %s8008_s13 }
 0x368   : > { %2644 = vrot.lane.b32.xlu1 %v8305_v19, %s8007_s22 }
 0x3c4   : > { %v1293_v36 = vpop.xlane.xlu1 %1292 }
 0x3c5   : > { %7810 = vrcp.f32 %v1293_v36 }
 0x3c8   : > { %v2025_v48 = vpop.permute.xlu1 %2024 }
 0x3cc   : > { %v2103_v50 = vpop.permute.xlu1 %2102 }
 0x3cf   : > { %v7811_v49 = vpop.eup %7810 }
 0x3d0   : > { %v1295_v38 = vmul.f32 %v7811_v49, %v7809_v43  ;;  %v2181_v54 = vpop.permute.xlu1 %2180 }
 0x3d2   : > { %v1304_v51 = vrot.slane %v1295_v38, %v8303_v17  ;;  %v1297_v52 = vcombine.high %v1295_v38, %v1295_v38 }
 0x3d4   : > { %v1320_v39 = vrot.slane %v1304_v51, %v8303_v17  ;;  %v1312_v53 = vcombine.high %v1304_v51, %v1304_v51  ;;  %v1311_v56 = vrot.slane %v1297_v52, %v8303_v17  ;;  %v2259_v60 = vpop.permute.xlu1 %2258 }
 0x3d6   : > { %7337 = vmatmul.mubr.msk.f32.vlgmr.msra.gmra.mrb[8].mxu1 %vm570_vm2, %v1320_v39  ;;  %v1334_v55 = vrot.slane %v1312_v53, %v8303_v17  ;;  %v1342_v57 = vcombine.high %v1320_v39, %v1320_v39  ;;  %v1313_v59 = vcombine.high %v1311_v56, %v1311_v56  ;;  %v1327_v61 = vrot.slane %v1311_v56, %v8303_v17 }
 0x3d7   : > { %7345 = vmatpush3.msra.mxu1 %v8319_v24  ;;  %7346 = vmatprep.mubr.msk.f32.mxu1 %vm8001_vm0, %v8002_v1 }
 0x3d8   : > { %7342 = vmatmul.mubr.msk.f32.vlgmr.msra.gmra.mrb[12].mxu0 %vm570_vm2, %v1334_v55  ;;  %7354 = vmatprep.subr.mxu1 %v8002_v1  ;;  %v1344_v58 = vcombine.high %v1334_v55, %v1334_v55  ;;  %v1341_v62 = vrot.slane %v1313_v59, %v8303_v17  ;;  %v1343_v63 = vcombine.high %v1327_v61, %v1327_v61  ;;  %v2415_v2 = vpop.permute.xlu1 %2414 }
 0x3d9   : > { %7350 = vmatpush3.msra.mxu0 %v8329_v27  ;;  %7351 = vmatprep.mubr.msk.f32.mxu0 %vm8001_vm0, %v8002_v1 }
 0x3da   : > { %7347 = vmatmul.mubr.msk.f32.vlgmr.msra.gmra.mrb[10].mxu1 %vm570_vm2, %v1342_v57  ;;  %7359 = vmatprep.subr.mxu0 %v8002_v1  ;;  %v1345_v3 = vcombine.high %v1341_v62, %v1341_v62 }
 0x3db   : > { %7355 = vmatpush3.msra.mxu1 %v8346_v30  ;;  %7356 = vmatprep.mubr.msk.f32.mxu1 %vm8001_vm0, %v8002_v1 }
 0x3dc   : > { %7352 = vmatmul.mubr.msk.f32.vlgmr.msra.gmra.mrb[14].mxu0 %vm570_vm2, %v1344_v58  ;;  %7364 = vmatprep.subr.mxu1 %v8002_v1  ;;  %v2493_v4 = vpop.permute.xlu1 %2492 }
 0x3dd   : > { %7360 = vmatpush3.msra.mxu0 %v8362_v32  ;;  %7361 = vmatprep.mubr.msk.f32.mxu0 %vm8001_vm0, %v8002_v1 }
 0x3de   : > { %7357 = vmatmul.mubr.msk.f32.vlgmr.msra.gmra.mrb[12].mxu1 %vm570_vm2, %v1327_v61  ;;  %7369 = vmatprep.subr.mxu0 %v8002_v1 }
 0x3df   : > { %7365 = vmatpush3.msra.mxu1 %v8377_v35  ;;  %7366 = vmatprep.mubr.msk.f32.mxu1 %vm8001_vm0, %v8002_v1 }
 0x3e0   : > { %7362 = vmatmul.mubr.msk.f32.vlgmr.msra.gmra.mrb[16].mxu0 %vm570_vm2, %v1341_v62  ;;  %7374 = vmatprep.subr.mxu1 %v8002_v1  ;;  %v2571_v5 = vpop.permute.xlu1 %2570 }
 0x3e1   : > { %7370 = vmatpush3.msra.mxu0 %v8392_v37  ;;  %7371 = vmatprep.mubr.msk.f32.mxu0 %vm8001_vm0, %v8002_v1 }
 0x3e2   : > { %7367 = vmatmul.mubr.msk.f32.vlgmr.msra.gmra.mrb[14].mxu1 %vm570_vm2, %v1343_v63  ;;  %7379 = vmatprep.subr.mxu0 %v8002_v1 }
 0x3e3   : > { %7375 = vmatpush3.msra.mxu1 %v1923_v31  ;;  %7376 = vmatprep.mubr.msk.f32.mxu1 %vm8001_vm0, %v8002_v1 }
 0x3e4   : > { %7372 = vmatmul.mubr.msk.f32.vlgmr.msra.gmra.mrb[18].mxu0 %vm570_vm2, %v1345_v3  ;;  %7384 = vmatprep.subr.mxu1 %v8002_v1  ;;  %v2647_v7 = vpop.permute.xlu1 %2646 }
 0x3e5   : > { %7381 = vmatprep.mubr.msk.f32.mxu0 %vm8001_vm0, %v8002_v1 }
 0x3e6   : > { %7377 = vmatmul.mubr.msk.f32.vlgmr.msra.gmra.mrb[16].mxu1 %vm570_vm2, %v1295_v38 }
 0x3e7   : > { %7386 = vmatprep.mubr.msk.f32.mxu1 %vm8001_vm0, %v8002_v1 }
 0x3e8   : > { %7380 = vmatpush3.xpose.msk.msra.mxu0 %vm570_vm2, %v8284_v9  ;;  %v2645_v8 = vpop.permute.xlu1 %2644 }
 0x3e9   : > { %7389 = vmatprep.subr.mxu0 %v8002_v1 }
 0x3ea   : > { %7385 = vmatpush3.xpose.msk.msra.mxu1 %vm570_vm2, %v8289_v10 }
 0x3eb   : > { %7382 = vmatmul.mubr.msk.f32.vlgmr.msra.gmra.mrb[20].mxu0 %vm570_vm2, %v2025_v48  ;;  %7394 = vmatprep.subr.mxu1 %v8002_v1 }
 0x3ec   : > { %7390 = vmatpush3.xpose.msk.msra.mxu0 %vm570_vm2, %v8319_v24  ;;  %7391 = vmatprep.mubr.msk.f32.mxu0 %vm8001_vm0, %v8002_v1 }
 0x3ed   : > { %7387 = vmatmul.mubr.msk.f32.vlgmr.msra.gmra.mrb[18].mxu1 %vm570_vm2, %v2103_v50  ;;  %7399 = vmatprep.subr.mxu0 %v8002_v1 }
 0x3ee   : > { %7395 = vmatpush3.xpose.msk.msra.mxu1 %vm570_vm2, %v8329_v27  ;;  %7396 = vmatprep.mubr.msk.f32.mxu1 %vm8001_vm0, %v8002_v1 }
 0x3ef   : > { %7392 = vmatmul.mubr.msk.f32.vlgmr.msra.gmra.mrb[22].mxu0 %vm570_vm2, %v2181_v54  ;;  %7404 = vmatprep.subr.mxu1 %v8002_v1 }
 0x3f0   : > { %7400 = vmatpush3.xpose.msk.msra.mxu0 %vm570_vm2, %v8346_v30  ;;  %7401 = vmatprep.mubr.msk.f32.mxu0 %vm8001_vm0, %v8002_v1 }
 0x3f1   : > { %7397 = vmatmul.mubr.msk.f32.vlgmr.msra.gmra.mrb[20].mxu1 %vm570_vm2, %v2259_v60  ;;  %7409 = vmatprep.subr.mxu0 %v8002_v1 }
 0x3f2   : > { %7405 = vmatpush3.xpose.msk.msra.mxu1 %vm570_vm2, %v8362_v32  ;;  %7406 = vmatprep.mubr.msk.f32.mxu1 %vm8001_vm0, %v8002_v1 }
 0x3f3   : > { %7402 = vmatmul.mubr.msk.f32.vlgmr.msra.gmra.mrb[24].mxu0 %vm570_vm2, %v2337_v6  ;;  %7414 = vmatprep.subr.mxu1 %v8002_v1 }
 0x3f4   : > { %7410 = vmatpush3.xpose.msk.msra.mxu0 %vm570_vm2, %v8377_v35  ;;  %7411 = vmatprep.mubr.msk.f32.mxu0 %vm8001_vm0, %v8002_v1 }
 0x3f5   : > { %7407 = vmatmul.mubr.msk.f32.vlgmr.msra.gmra.mrb[22].mxu1 %vm570_vm2, %v2415_v2  ;;  %7419 = vmatprep.subr.mxu0 %v8002_v1 }
 0x3f6   : > { %7415 = vmatpush3.xpose.msk.msra.mxu1 %vm570_vm2, %v8392_v37  ;;  %7416 = vmatprep.mubr.msk.f32.mxu1 %vm8001_vm0, %v8002_v1 }
 0x3f7   : > { %7412 = vmatmul.mubr.msk.f32.vlgmr.msra.gmra.mrb[26].mxu0 %vm570_vm2, %v2493_v4  ;;  %7424 = vmatprep.subr.mxu1 %v8002_v1 }
 0x3f8   : > { %7420 = vmatpush3.xpose.msk.msra.mxu0 %vm570_vm2, %v2647_v7  ;;  %7421 = vmatprep.mubr.msk.f32.mxu0 %vm8001_vm0, %v8002_v1 }
 0x3f9   : > { %7417 = vmatmul.mubr.msk.f32.vlgmr.msra.gmra.mrb[24].mxu1 %vm570_vm2, %v2571_v5  ;;  %7429 = vmatprep.subr.mxu0 %v8002_v1 }
 0x3fa   : > { %7425 = vmatpush3.msra.mxu1 %v8284_v9  ;;  %7426 = vmatprep.mubr.msk.f32.mxu1 %vm8001_vm0, %v8002_v1 }
 0x3fb   : > { %7422 = vmatmul.mubr.msk.f32.vlgmr.msra.gmra.mrb[28].mxu0 %vm570_vm2, %v2645_v8  ;;  %7434 = vmatprep.subr.mxu1 %v8002_v1 }
 0x3fc   : > { %7430 = vmatpush3.msra.mxu0 %v8289_v10  ;;  %7431 = vmatprep.mubr.msk.f32.mxu0 %vm8001_vm0, %v8002_v1 }
 0x3fd   : > { %7439 = vmatprep.subr.mxu0 %v8002_v1 }
 0x4a9   : > { %v1414_v11 = vpop.f32.mrb[8].mxu1 }
 0x4aa   : > { %v7338_v12 = vpop.f32.mrb[9].mxu1 }
 0x4ab   : > { %v1486_v13 = vpop.f32.mrb[12].mxu0 }
 0x4ac   : > { %v1933_v16 = vrot.slane %v1486_v13, 7  ;;  %v7343_v18 = vpop.f32.mrb[13].mxu0 }
 0x4ad   : > { %v1558_v20 = vpop.f32.mrb[10].mxu1 }
 0x4ae   : > { %v1934_v22 = vsel %vm1182_vm3, %v1933_v16, %v1414_v11  ;;  %v1935_v25 = vrot.slane %v1558_v20, 6  ;;  %v7348_v28 = vpop.f32.mrb[11].mxu1 }
 0x4af   : > { %v1630_v40 = vpop.f32.mrb[14].mxu0 }
 0x4b0   : > { %v1936_v41 = vsel %vm1185_vm4, %v1935_v25, %v1934_v22  ;;  %v1937_v42 = vrot.slane %v1630_v40, 5  ;;  %v7353_v43 = vpop.f32.mrb[15].mxu0 }
 0x4b1   : > { %v1702_v44 = vpop.f32.mrb[12].mxu1 }
 0x4b2   : > { %v1938_v31 = vsel %vm1188_vm5, %v1937_v42, %v1936_v41  ;;  %v1939_v36 = vrot.slane %v1702_v44, 4  ;;  %v7358_v48 = vpop.f32.mrb[13].mxu1 }
 0x4b3   : > { %v1774_v49 = vpop.f32.mrb[16].mxu0 }
 0x4b4   : > { %v1940_v38 = vsel %vm1191_vm6, %v1939_v36, %v1938_v31  ;;  %v1941_v50 = vrot.slane %v1774_v49, 3  ;;  %v7363_v51 = vpop.f32.mrb[17].mxu0 }
 0x4b5   : > { %v1846_v52 = vpop.f32.mrb[14].mxu1 }
 0x4b6   : > { %v1942_v39 = vsel %vm1194_vm7, %v1941_v50, %v1940_v38  ;;  %v1943_v53 = vrot.slane %v1846_v52, 2  ;;  %v7368_v54 = vpop.f32.mrb[15].mxu1 }
 0x4b7   : > { %v1918_v55 = vpop.f32.mrb[18].mxu0 }
 0x4b8   : > { %v1945_v56 = vrot.slane %v1918_v55, 1  ;;  %v7373_v57 = vpop.f32.mrb[19].mxu0  ;;  %v1944_v58 = vsel %vm1197_vm8, %v1943_v53, %v1942_v39 }
 0x4b9   : > { %v2016_v59 = vpop.f32.mrb[16].mxu1 }
 0x4ba   : > { %v1946_v60 = vsel %vm1200_vm9, %v1945_v56, %v1944_v58  ;;  %v7378_v61 = vpop.f32.mrb[17].mxu1 }
 0x4bb   : > { %v8605_v62 = vadd.f32 %v2016_v59, %v1946_v60 }
 0x4be   : > { %v2094_v63 = vpop.f32.mrb[20].mxu0 }
 0x4bf   : > { %v7383_v2 = vpop.f32.mrb[21].mxu0 }
 0x4c0   : > { %v2172_v3 = vpop.f32.mrb[18].mxu1 }
 0x4c1   : > { %v2656_v4 = vrot.slane %v2172_v3, 7  ;;  %v7388_v5 = vpop.f32.mrb[19].mxu1 }
 0x4c2   : > { %v2250_v6 = vpop.f32.mrb[22].mxu0 }
 0x4c3   : > { %v2657_v7 = vsel %vm1182_vm3, %v2656_v4, %v2094_v63  ;;  %v2658_v8 = vrot.slane %v2250_v6, 6  ;;  %v7393_v11 = vpop.f32.mrb[23].mxu0 }
 0x4c4   : > { %v2328_v12 = vpop.f32.mrb[20].mxu1 }
 0x4c5   : > { %v2659_v13 = vsel %vm1185_vm4, %v2658_v8, %v2657_v7  ;;  %v2660_v16 = vrot.slane %v2328_v12, 5  ;;  %v7398_v18 = vpop.f32.mrb[21].mxu1 }
 0x4c6   : > { %v2406_v20 = vpop.f32.mrb[24].mxu0 }
 0x4c7   : > { %v2661_v22 = vsel %vm1188_vm5, %v2660_v16, %v2659_v13  ;;  %v2662_v25 = vrot.slane %v2406_v20, 4  ;;  %v7403_v28 = vpop.f32.mrb[25].mxu0 }
 0x4c8   : > { %v2484_v40 = vpop.f32.mrb[22].mxu1 }
 0x4c9   : > { %v2663_v41 = vsel %vm1191_vm6, %v2662_v25, %v2661_v22  ;;  %v2664_v42 = vrot.slane %v2484_v40, 3  ;;  %v7408_v43 = vpop.f32.mrb[23].mxu1 }
 0x4ca   : > { %v2562_v44 = vpop.f32.mrb[26].mxu0 }
 0x4cb   : > { %v2665_v31 = vsel %vm1194_vm7, %v2664_v42, %v2663_v41  ;;  %v2666_v36 = vrot.slane %v2562_v44, 2  ;;  %v7413_v48 = vpop.f32.mrb[27].mxu0  ;;  %v516_v41 = vld [vmem:[#allocation5] sm:$0xff] }
 0x4cc   : > { %v2640_v49 = vpop.f32.mrb[24].mxu1 }
 0x4cd   : > { %v2668_v38 = vrot.slane %v2640_v49, 1  ;;  %v7418_v50 = vpop.f32.mrb[25].mxu1  ;;  %v2667_v51 = vsel %vm1197_vm8, %v2666_v36, %v2665_v31 }
 0x4ce   : > { %v2741_v52 = vpop.f32.mrb[28].mxu0 }
 0x4cf   : > { %v2669_v39 = vsel %vm1200_vm9, %v2668_v38, %v2667_v51  ;;  %v7423_v53 = vpop.f32.mrb[29].mxu0 }
 0x4d0   : > { %v2742_v54 = vadd.f32 %v2741_v52, %v2669_v39 }
 0x4d2   : > { %v2745_v55 = vmul.f32 0.35355338, %v2742_v54 }
 0x4d4   : > { %v2746_v56 = vadd.f32 %v2745_v55, %v8448_v21 }
 0x4d6   : > { %v2747_v57 = vsel %vm570_vm2, %v2746_v56, -inf }
 0x4d7   : > { %2748 = vmax.xlane.f32.xlu0 %v2747_v57 }
 0x4ed   : > { %3384 = vrot.lane.b32.xlu0 %v8305_v19, %s8009_s20 }
 0x4f1   : > { %3702 = vrot.lane.b32.xlu0 %v8465_v34, %s8010_s24 }
 0x4f5   : > { %3850 = vrot.lane.b32.xlu0 %v8475_v47, %s8010_s24 }
 0x4f9   : > { %3998 = vrot.lane.b32.xlu0 %v8480_v23, %s8010_s24 }
 0x4fd   : > { %4146 = vrot.lane.b32.xlu0 %v8490_v29, %s8010_s24 }
 0x501   : > { %4220 = vrot.lane.b32.xlu0 %v8305_v19, %s8010_s24 }
 0x564   : > { %v2749_v58 = vpop.xlane.xlu0 %2748 }
 0x565   : > { %v2750_v59 = vsub.f32 %v2746_v56, %v2749_v58 }
 0x567   : > { %v2751_v60 = vmul.f32 1.442695, %v2750_v59 }
 0x568   : > { %v3385_v28 = vpop.permute.xlu0 %3384 }
 0x569   : > { %7812 = vpow2.f32 %v2751_v60 }
 0x56c   : > { %v3703_v42 = vpop.permute.xlu0 %3702 }
 0x570   : > { %v3851_v43 = vpop.permute.xlu0 %3850 }
 0x573   : > { %v7813_v61 = vpop.eup %7812 }
 0x574   : > { %v2753_v63 = vsel %vm570_vm2, %v7813_v61, 0.0 }
 0x575   : > { %2754 = vadd.xlane.f32.xlu1 %v2753_v63 }
 0x586   : > { %3628 = vrot.lane.b32.xlu1 %v8460_v45, %s8010_s24 }
 0x58a   : > { %3776 = vrot.lane.b32.xlu1 %v8470_v46, %s8010_s24 }
 0x58e   : > { %3924 = vrot.lane.b32.xlu1 %v8454_v33, %s8010_s24 }
 0x592   : > { %4072 = vrot.lane.b32.xlu1 %v8485_v26, %s8010_s24  ;;  %s7104_s24 = sshll.u32 %s8093_s17, 7  ;;  %s8016_s17 = smov [#allocation8]  }
 0x596   : > { %4222 = vrot.lane.b32.xlu1 %v8305_v19, %s8011_s26  ;;  %s8015_s26 = smov 40  }
 0x602   : > { %v2755_v2 = vpop.xlane.xlu1 %2754 }
 0x603   : > { %7814 = vrcp.f32 %v2755_v2 }
 0x606   : > { %v3629_v2 = vpop.permute.xlu1 %3628 }
 0x60d   : > { %v7815_v3 = vpop.eup %7814 }
 0x60e   : > { %v2757_v4 = vmul.f32 %v7815_v3, %v7813_v61 }
 0x610   : > { %v2766_v5 = vrot.slane %v2757_v4, %v8303_v17  ;;  %v2759_v6 = vcombine.high %v2757_v4, %v2757_v4 }
 0x612   : > { %v2782_v7 = vrot.slane %v2766_v5, %v8303_v17  ;;  %v2774_v8 = vcombine.high %v2766_v5, %v2766_v5  ;;  %v2773_v12 = vrot.slane %v2759_v6, %v8303_v17 }
 0x614   : > { %7427 = vmatmul.mubr.msk.f32.vlgmr.msra.gmra.mrb[26].mxu1 %vm570_vm2, %v2782_v7  ;;  %v2796_v11 = vrot.slane %v2774_v8, %v8303_v17  ;;  %v2804_v13 = vcombine.high %v2782_v7, %v2782_v7  ;;  %v2775_v18 = vcombine.high %v2773_v12, %v2773_v12  ;;  %v2789_v20 = vrot.slane %v2773_v12, %v8303_v17 }
 0x615   : > { %7435 = vmatpush3.msra.mxu1 %v8319_v24  ;;  %7436 = vmatprep.mubr.msk.f32.mxu1 %vm8001_vm0, %v8002_v1 }
 0x616   : > { %7432 = vmatmul.mubr.msk.f32.vlgmr.msra.gmra.mrb[30].mxu0 %vm570_vm2, %v2796_v11  ;;  %7444 = vmatprep.subr.mxu1 %v8002_v1  ;;  %v2806_v16 = vcombine.high %v2796_v11, %v2796_v11  ;;  %v2803_v22 = vrot.slane %v2775_v18, %v8303_v17  ;;  %v2805_v25 = vcombine.high %v2789_v20, %v2789_v20 }
 0x617   : > { %7440 = vmatpush3.msra.mxu0 %v8329_v27  ;;  %7441 = vmatprep.mubr.msk.f32.mxu0 %vm8001_vm0, %v8002_v1 }
 0x618   : > { %7437 = vmatmul.mubr.msk.f32.vlgmr.msra.gmra.mrb[28].mxu1 %vm570_vm2, %v2804_v13  ;;  %7449 = vmatprep.subr.mxu0 %v8002_v1  ;;  %v2807_v40 = vcombine.high %v2803_v22, %v2803_v22 }
 0x619   : > { %7445 = vmatpush3.msra.mxu1 %v8346_v30  ;;  %7446 = vmatprep.mubr.msk.f32.mxu1 %vm8001_vm0, %v8002_v1 }
 0x61a   : > { %7442 = vmatmul.mubr.msk.f32.vlgmr.msra.gmra.mrb[32].mxu0 %vm570_vm2, %v2806_v16  ;;  %7454 = vmatprep.subr.mxu1 %v8002_v1 }
 0x61b   : > { %7450 = vmatpush3.msra.mxu0 %v8362_v32  ;;  %7451 = vmatprep.mubr.msk.f32.mxu0 %vm8001_vm0, %v8002_v1 }
 0x61c   : > { %7447 = vmatmul.mubr.msk.f32.vlgmr.msra.gmra.mrb[30].mxu1 %vm570_vm2, %v2789_v20  ;;  %7459 = vmatprep.subr.mxu0 %v8002_v1  ;;  %v3777_v20 = vpop.permute.xlu1 %3776 }
 0x61d   : > { %7455 = vmatpush3.msra.mxu1 %v8377_v35  ;;  %7456 = vmatprep.mubr.msk.f32.mxu1 %vm8001_vm0, %v8002_v1 }
 0x61e   : > { %7452 = vmatmul.mubr.msk.f32.vlgmr.msra.gmra.mrb[34].mxu0 %vm570_vm2, %v2803_v22  ;;  %7464 = vmatprep.subr.mxu1 %v8002_v1 }
 0x61f   : > { %7460 = vmatpush3.msra.mxu0 %v8392_v37  ;;  %7461 = vmatprep.mubr.msk.f32.mxu0 %vm8001_vm0, %v8002_v1 }
 0x620   : > { %7457 = vmatmul.mubr.msk.f32.vlgmr.msra.gmra.mrb[32].mxu1 %vm570_vm2, %v2805_v25  ;;  %7469 = vmatprep.subr.mxu0 %v8002_v1 }
 0x621   : > { %7465 = vmatpush3.msra.mxu1 %v3385_v28  ;;  %7466 = vmatprep.mubr.msk.f32.mxu1 %vm8001_vm0, %v8002_v1 }
 0x622   : > { %7462 = vmatmul.mubr.msk.f32.vlgmr.msra.gmra.mrb[36].mxu0 %vm570_vm2, %v2807_v40  ;;  %7474 = vmatprep.subr.mxu1 %v8002_v1  ;;  %v3925_v40 = vpop.permute.xlu1 %3924 }
 0x623   : > { %7471 = vmatprep.mubr.msk.f32.mxu0 %vm8001_vm0, %v8002_v1 }
 0x624   : > { %7467 = vmatmul.mubr.msk.f32.vlgmr.msra.gmra.mrb[34].mxu1 %vm570_vm2, %v2757_v4 }
 0x625   : > { %7475 = vmatpush3.msra.mxu1 %v516_v41  ;;  %7476 = vmatprep.mubr.msk.f32.mxu1 %vm8001_vm0, %v8002_v1 }
 0x626   : > { %7484 = vmatprep.subr.mxu1 %v8002_v1 }
 0x628   : > { %7477 = vmatmul.mubr.msk.f32.vlgmr.msra.gmra.mrb[36].mxu1 %vm570_vm2, %v8605_v62  ;;  %v3999_v62 = vpop.permute.xlu0 %3998 }
 0x629   : > { %7486 = vmatprep.mubr.msk.f32.mxu1 %vm8001_vm0, %v8002_v1 }
 0x62c   : > { %7485 = vmatpush3.xpose.msk.msra.mxu1 %vm570_vm2, %v8289_v10 }
 0x62d   : > { %7494 = vmatprep.subr.mxu1 %v8002_v1 }
 0x62f   : > { %7487 = vmatmul.mubr.msk.f32.vlgmr.msra.gmra.mrb[38].mxu1 %vm570_vm2, %v3703_v42 }
 0x630   : > { %7495 = vmatpush3.xpose.msk.msra.mxu1 %vm570_vm2, %v8329_v27  ;;  %7496 = vmatprep.mubr.msk.f32.mxu1 %vm8001_vm0, %v8002_v1  ;;  %v4147_v27 = vpop.permute.xlu0 %4146 }
 0x631   : > { %7504 = vmatprep.subr.mxu1 %v8002_v1 }
 0x633   : > { %7497 = vmatmul.mubr.msk.f32.vlgmr.msra.gmra.mrb[40].mxu1 %vm570_vm2, %v3851_v43 }
 0x634   : > { %7505 = vmatpush3.xpose.msk.msra.mxu1 %vm570_vm2, %v8362_v32  ;;  %7506 = vmatprep.mubr.msk.f32.mxu1 %vm8001_vm0, %v8002_v1  ;;  %v517_v32 = vld [vmem:[#allocation5 + $0x8] sm:$0xff] }
 0x635   : > { %7514 = vmatprep.subr.mxu1 %v8002_v1  ;;  %7470 = vmatpush3.msra.mxu0 %v517_v32  ;;  %v4221_v32 = vpop.permute.xlu0 %4220 }
 0x636   : > { %7479 = vmatprep.subr.mxu0 %v8002_v1 }
 0x637   : > { %7507 = vmatmul.mubr.msk.f32.vlgmr.msra.gmra.mrb[42].mxu1 %vm570_vm2, %v3999_v62 }
 0x638   : > { %7515 = vmatpush3.xpose.msk.msra.mxu1 %vm570_vm2, %v8392_v37  ;;  %7516 = vmatprep.mubr.msk.f32.mxu1 %vm8001_vm0, %v8002_v1 }
 0x639   : > { %7524 = vmatprep.subr.mxu1 %v8002_v1 }
 0x63b   : > { %7517 = vmatmul.mubr.msk.f32.vlgmr.msra.gmra.mrb[44].mxu1 %vm570_vm2, %v4147_v27 }
 0x63c   : > { %7525 = vmatpush3.msra.mxu1 %v8284_v9  ;;  %7526 = vmatprep.mubr.msk.f32.mxu1 %vm8001_vm0, %v8002_v1 }
 0x63d   : > { %7534 = vmatprep.subr.mxu1 %v8002_v1 }
 0x6e7   : > { %v2876_v37 = vpop.f32.mrb[26].mxu1 }
 0x6e8   : > { %v7428_v44 = vpop.f32.mrb[27].mxu1 }
 0x6e9   : > { %v2948_v31 = vpop.f32.mrb[30].mxu0 }
 0x6ea   : > { %v3395_v36 = vrot.slane %v2948_v31, 7  ;;  %v7433_v48 = vpop.f32.mrb[31].mxu0 }
 0x6eb   : > { %v3020_v49 = vpop.f32.mrb[28].mxu1 }
 0x6ec   : > { %v3396_v38 = vsel %vm1182_vm3, %v3395_v36, %v2876_v37  ;;  %v3397_v50 = vrot.slane %v3020_v49, 6  ;;  %v7438_v51 = vpop.f32.mrb[29].mxu1 }
 0x6ed   : > { %v3092_v52 = vpop.f32.mrb[32].mxu0 }
 0x6ee   : > { %v3398_v39 = vsel %vm1185_vm4, %v3397_v50, %v3396_v38  ;;  %v3399_v53 = vrot.slane %v3092_v52, 5  ;;  %v7443_v54 = vpop.f32.mrb[33].mxu0 }
 0x6ef   : > { %v3164_v55 = vpop.f32.mrb[30].mxu1 }
 0x6f0   : > { %v3400_v56 = vsel %vm1188_vm5, %v3399_v53, %v3398_v39  ;;  %v3401_v57 = vrot.slane %v3164_v55, 4  ;;  %v7448_v58 = vpop.f32.mrb[31].mxu1 }
 0x6f1   : > { %v3236_v59 = vpop.f32.mrb[34].mxu0 }
 0x6f2   : > { %v3402_v60 = vsel %vm1191_vm6, %v3401_v57, %v3400_v56  ;;  %v3403_v61 = vrot.slane %v3236_v59, 3  ;;  %v7453_v63 = vpop.f32.mrb[35].mxu0 }
 0x6f3   : > { %v3308_v3 = vpop.f32.mrb[32].mxu1 }
 0x6f4   : > { %v3404_v4 = vsel %vm1194_vm7, %v3403_v61, %v3402_v60  ;;  %v3405_v5 = vrot.slane %v3308_v3, 2  ;;  %v7458_v6 = vpop.f32.mrb[33].mxu1 }
 0x6f5   : > { %v3380_v7 = vpop.f32.mrb[36].mxu0 }
 0x6f6   : > { %v3407_v8 = vrot.slane %v3380_v7, 1  ;;  %v7463_v11 = vpop.f32.mrb[37].mxu0  ;;  %v3406_v12 = vsel %vm1197_vm8, %v3405_v5, %v3404_v4 }
 0x6f7   : > { %v3478_v13 = vpop.f32.mrb[34].mxu1 }
 0x6f8   : > { %v3408_v16 = vsel %vm1200_vm9, %v3407_v8, %v3406_v12  ;;  %v7468_v18 = vpop.f32.mrb[35].mxu1 }
 0x6f9   : > { %v3479_v22 = vadd.f32 %v3478_v13, %v3408_v16 }
 0x6fb   : > { %7472 = vmatmul.mubr.msk.f32.vlgmr.msra.gmra.mrb[38].mxu0 %vm570_vm2, %v3479_v22  ;;  %v3624_v25 = vpop.f32.mrb[36].mxu1 }
 0x6fc   : > { %7480 = vmatpush3.xpose.msk.msra.mxu0 %vm570_vm2, %v8284_v9  ;;  %v7478_v28 = vpop.f32.mrb[37].mxu1  ;;  %7481 = vmatprep.mubr.msk.f32.mxu0 %vm8001_vm0, %v8002_v1  ;;  %v4073_v9 = vpop.permute.xlu1 %4072 }
 0x6fd   : > { %7489 = vmatprep.subr.mxu0 %v8002_v1 }
 0x6ff   : > { %7482 = vmatmul.mubr.msk.f32.vlgmr.msra.gmra.mrb[40].mxu0 %vm570_vm2, %v3629_v2 }
 0x700   : > { %7490 = vmatpush3.xpose.msk.msra.mxu0 %vm570_vm2, %v8319_v24  ;;  %7491 = vmatprep.mubr.msk.f32.mxu0 %vm8001_vm0, %v8002_v1 }
 0x701   : > { %7499 = vmatprep.subr.mxu0 %v8002_v1 }
 0x702   : > { %v3772_v41 = vpop.f32.mrb[38].mxu1 }
 0x703   : > { %v7488_v42 = vpop.f32.mrb[39].mxu1  ;;  %7492 = vmatmul.mubr.msk.f32.vlgmr.msra.gmra.mrb[42].mxu0 %vm570_vm2, %v3777_v20  ;;  %v4232_v48 = vrot.slane %v3772_v41, 7 }
 0x704   : > { %7500 = vmatpush3.xpose.msk.msra.mxu0 %vm570_vm2, %v8346_v30  ;;  %7501 = vmatprep.mubr.msk.f32.mxu0 %vm8001_vm0, %v8002_v1  ;;  %v4223_v30 = vpop.permute.xlu1 %4222  ;;  %v8788_v42 = vld [vmem:[%s9111_s2 + $0x18] sm:$0xff] }
 0x705   : > { %7509 = vmatprep.subr.mxu0 %v8002_v1 }
 0x706   : > { %v3920_v43 = vpop.f32.mrb[40].mxu1 }
 0x707   : > { %v7498_v24 = vpop.f32.mrb[41].mxu1  ;;  %7502 = vmatmul.mubr.msk.f32.vlgmr.msra.gmra.mrb[44].mxu0 %vm570_vm2, %v3925_v40  ;;  %v4236_v53 = vrot.slane %v3920_v43, 5 }
 0x708   : > { %7510 = vmatpush3.xpose.msk.msra.mxu0 %vm570_vm2, %v8377_v35  ;;  %7511 = vmatprep.mubr.msk.f32.mxu0 %vm8001_vm0, %v8002_v1  ;;  %v8798_v24 = vld [vmem:[%s9111_s2 + $0x20] sm:$0xff] }
 0x709   : > { %7519 = vmatprep.subr.mxu0 %v8002_v1 }
 0x70a   : > { %v4068_v62 = vpop.f32.mrb[42].mxu1 }
 0x70b   : > { %v7508_v27 = vpop.f32.mrb[43].mxu1  ;;  %7512 = vmatmul.mubr.msk.f32.vlgmr.msra.gmra.mrb[46].mxu0 %vm570_vm2, %v4073_v9  ;;  %v4240_v58 = vrot.slane %v4068_v62, 3 }
 0x70c   : > { %7520 = vmatpush3.xpose.msk.msra.mxu0 %vm570_vm2, %v4223_v30  ;;  %7521 = vmatprep.mubr.msk.f32.mxu0 %vm8001_vm0, %v8002_v1  ;;  %v8809_v30 = vld [vmem:[%s9111_s2 + $0x28] sm:$0xff] }
 0x70d   : > { %7529 = vmatprep.subr.mxu0 %v8002_v1 }
 0x70e   : > { %v4216_v37 = vpop.f32.mrb[44].mxu1 }
 0x70f   : > { %v7518_v35 = vpop.f32.mrb[45].mxu1  ;;  %7522 = vmatmul.mubr.msk.f32.vlgmr.msra.gmra.mrb[48].mxu0 %vm570_vm2, %v4221_v32  ;;  %v4244_v3 = vrot.slane %v4216_v37, 1  ;;  %v8820_v37 = vld [vmem:[%s9111_s2 + $0x30] sm:$0xff] }
 0x710   : > { %7530 = vmatpush3.msra.mxu0 %v8289_v10  ;;  %7531 = vmatprep.mubr.msk.f32.mxu0 %vm8001_vm0, %v8002_v1 }
 0x711   : > { %7539 = vmatprep.subr.mxu0 %v8002_v1 }
 0x7ce   : > { %v3551_v44 = vpop.f32.mrb[38].mxu0 }
 0x7cf   : > { %v8747_v31 = vadd.f32 %v3624_v25, %v3551_v44  ;;  %v7473_v36 = vpop.f32.mrb[39].mxu0 }
 0x7d0   : > { %v8830_v36 = vld [vmem:[%s9111_s2 + $0x38] sm:$0xff] }
 0x7d2   : > { %v3698_v49 = vpop.f32.mrb[40].mxu0 }
 0x7d3   : > { %v4233_v38 = vsel %vm1182_vm3, %v4232_v48, %v3698_v49  ;;  %v7483_v50 = vpop.f32.mrb[41].mxu0 }
 0x7d6   : > { %v3846_v51 = vpop.f32.mrb[42].mxu0 }
 0x7d7   : > { %v4234_v52 = vrot.slane %v3846_v51, 6  ;;  %v7493_v39 = vpop.f32.mrb[43].mxu0  ;;  %v8853_v51 = vld [vmem:[%s9111_s2] sm:$0xff] }
 0x7d9   : > { %v4235_v10 = vsel %vm1185_vm4, %v4234_v52, %v4233_v38 }
 0x7da   : > { %v3994_v54 = vpop.f32.mrb[44].mxu0  ;;  %v4237_v55 = vsel %vm1188_vm5, %v4236_v53, %v4235_v10 }
 0x7db   : > { %v4238_v56 = vrot.slane %v3994_v54, 4  ;;  %v7503_v57 = vpop.f32.mrb[45].mxu0 }
 0x7dc   : > { %v518_v57 = vld [vmem:[#allocation5 + $0x10] sm:$0xff] }
 0x7dd   : > { %v4239_v59 = vsel %vm1191_vm6, %v4238_v56, %v4237_v55  ;;  %v7835_v56 = vld [vmem:[%s9111_s2 + $0x8] sm:$0xff] }
 0x7de   : > { %v4142_v60 = vpop.f32.mrb[46].mxu0  ;;  %v4241_v61 = vsel %vm1194_vm7, %v4240_v58, %v4239_v59 }
 0x7df   : > { %v4242_v63 = vrot.slane %v4142_v60, 2  ;;  %v7513_v2 = vpop.f32.mrb[47].mxu0 }
 0x7e1   : > { %v4243_v4 = vsel %vm1197_vm8, %v4242_v63, %v4241_v61 }
 0x7e2   : > { %v4245_v5 = vsel %vm1200_vm9, %v4244_v3, %v4243_v4  ;;  %v4317_v6 = vpop.f32.mrb[48].mxu0 }
 0x7e3   : > { %v4318_v7 = vadd.f32 %v4317_v6, %v4245_v5  ;;  %v7523_v8 = vpop.f32.mrb[49].mxu0 }
 0x7e5   : > { %v4321_v11 = vmul.f32 0.35355338, %v4318_v7 }
 0x7e7   : > { %v4322_v12 = vadd.f32 %v4321_v11, %v8448_v21 }
 0x7e9   : > { %v4323_v13 = vsel %vm570_vm2, %v4322_v12, -inf }
 0x7ea   : > { %4324 = vmax.xlane.f32.xlu1 %v4323_v13 }
 0x7fb   : > { %5132 = vrot.lane.b32.xlu1 %v8460_v45, %s8012_s18 }
 0x7ff   : > { %5206 = vrot.lane.b32.xlu1 %v8465_v34, %s8012_s18 }
 0x803   : > { %5354 = vrot.lane.b32.xlu1 %v8475_v47, %s8012_s18 }
 0x807   : > { %5502 = vrot.lane.b32.xlu1 %v8480_v23, %s8012_s18 }
 0x80b   : > { %5650 = vrot.lane.b32.xlu1 %v8490_v29, %s8012_s18 }
 0x80f   : > { %5724 = vrot.lane.b32.xlu1 %v8305_v19, %s8012_s18 }
 0x877   : > { %v4325_v16 = vpop.xlane.xlu1 %4324 }
 0x878   : > { %v4326_v18 = vsub.f32 %v4322_v12, %v4325_v16 }
 0x87a   : > { %v4327_v20 = vmul.f32 1.442695, %v4326_v18 }
 0x87b   : > { %v5133_v27 = vpop.permute.xlu1 %5132 }
 0x87c   : > { %7816 = vpow2.f32 %v4327_v20 }
 0x87f   : > { %v8839_v49 = vpop.permute.xlu1 %5206 }
 0x883   : > { %v8848_v50 = vpop.permute.xlu1 %5354 }
 0x886   : > { %v7817_v22 = vpop.eup %7816 }
 0x887   : > { %v4329_v25 = vsel %vm570_vm2, %v7817_v22, 0.0  ;;  %v8864_v39 = vpop.permute.xlu1 %5502 }
 0x888   : > { %4330 = vadd.xlane.f32.xlu0 %v4329_v25 }
 0x88b   : > { %v8873_v10 = vpop.permute.xlu1 %5650 }
 0x88f   : > { %v5725_v55 = vpop.permute.xlu1 %5724 }
 0x89e   : > { %4960 = vrot.lane.b32.xlu0 %v8305_v19, %s8013_s27 }
 0x8a2   : > { %5280 = vrot.lane.b32.xlu0 %v8470_v46, %s8012_s18 }
 0x8a6   : > { %5428 = vrot.lane.b32.xlu0 %v8454_v33, %s8012_s18 }
 0x8aa   : > { %5576 = vrot.lane.b32.xlu0 %v8485_v26, %s8012_s18  ;;  %v8778_v26 = vld [vmem:[%s9111_s2 + $0x10] sm:$0xff] }
 0x8ae   : > { %5726 = vrot.lane.b32.xlu0 %v8305_v19, %s8014_s23  ;;  %s9064_s23 = scalar_lea.hbm %s9119_s10, %s7104_s24 }
 0x915   : > { %v4331_v45 = vpop.xlane.xlu0 %4330 }
 0x916   : > { %7818 = vrcp.f32 %v4331_v45 }
 0x919   : > { %v4961_v44 = vpop.permute.xlu0 %4960 }
 0x91d   : > { %v5281_v38 = vpop.permute.xlu0 %5280 }
 0x920   : > { %v7819_v34 = vpop.eup %7818 }
 0x921   : > { %v4333_v47 = vmul.f32 %v7819_v34, %v7817_v22  ;;  %v5429_v52 = vpop.permute.xlu0 %5428 }
 0x923   : > { %v4342_v23 = vrot.slane %v4333_v47, %v8303_v17  ;;  %v4335_v29 = vcombine.high %v4333_v47, %v4333_v47 }
 0x925   : > { %v4358_v28 = vrot.slane %v4342_v23, %v8303_v17  ;;  %v4350_v40 = vcombine.high %v4342_v23, %v4342_v23  ;;  %v4349_v33 = vrot.slane %v4335_v29, %v8303_v17  ;;  %v5577_v53 = vpop.permute.xlu0 %5576 }
 0x927   : > { %7527 = vmatmul.mubr.msk.f32.vlgmr.msra.gmra.mrb[46].mxu1 %vm570_vm2, %v4358_v28  ;;  %v4372_v46 = vrot.slane %v4350_v40, %v8303_v17  ;;  %v4380_v41 = vcombine.high %v4358_v28, %v4358_v28  ;;  %v4351_v43 = vcombine.high %v4349_v33, %v4349_v33  ;;  %v4365_v62 = vrot.slane %v4349_v33, %v8303_v17 }
 0x928   : > { %7535 = vmatpush3.msra.mxu1 %v8778_v26  ;;  %7536 = vmatprep.mubr.msk.f32.mxu1 %vm8001_vm0, %v8002_v1 }
 0x929   : > { %7532 = vmatmul.mubr.msk.f32.vlgmr.msra.gmra.mrb[50].mxu0 %vm570_vm2, %v4372_v46  ;;  %7544 = vmatprep.subr.mxu1 %v8002_v1  ;;  %v4382_v9 = vcombine.high %v4372_v46, %v4372_v46  ;;  %v4379_v32 = vrot.slane %v4351_v43, %v8303_v17  ;;  %v4381_v35 = vcombine.high %v4365_v62, %v4365_v62  ;;  %v5727_v54 = vpop.permute.xlu0 %5726 }
 0x92a   : > { %7540 = vmatpush3.msra.mxu0 %v8788_v42  ;;  %7541 = vmatprep.mubr.msk.f32.mxu0 %vm8001_vm0, %v8002_v1 }
 0x92b   : > { %7537 = vmatmul.mubr.msk.f32.vlgmr.msra.gmra.mrb[48].mxu1 %vm570_vm2, %v4380_v41  ;;  %7549 = vmatprep.subr.mxu0 %v8002_v1  ;;  %v4383_v48 = vcombine.high %v4379_v32, %v4379_v32 }
 0x92c   : > { %7545 = vmatpush3.msra.mxu1 %v8798_v24  ;;  %7546 = vmatprep.mubr.msk.f32.mxu1 %vm8001_vm0, %v8002_v1 }
 0x92d   : > { %7542 = vmatmul.mubr.msk.f32.vlgmr.msra.gmra.mrb[52].mxu0 %vm570_vm2, %v4382_v9  ;;  %7554 = vmatprep.subr.mxu1 %v8002_v1 }
 0x92e   : > { %7550 = vmatpush3.msra.mxu0 %v8809_v30  ;;  %7551 = vmatprep.mubr.msk.f32.mxu0 %vm8001_vm0, %v8002_v1 }
 0x92f   : > { %7547 = vmatmul.mubr.msk.f32.vlgmr.msra.gmra.mrb[50].mxu1 %vm570_vm2, %v4365_v62  ;;  %7559 = vmatprep.subr.mxu0 %v8002_v1 }
 0x930   : > { %7555 = vmatpush3.msra.mxu1 %v8820_v37  ;;  %7556 = vmatprep.mubr.msk.f32.mxu1 %vm8001_vm0, %v8002_v1 }
 0x931   : > { %7552 = vmatmul.mubr.msk.f32.vlgmr.msra.gmra.mrb[54].mxu0 %vm570_vm2, %v4379_v32  ;;  %7564 = vmatprep.subr.mxu1 %v8002_v1 }
 0x932   : > { %7560 = vmatpush3.msra.mxu0 %v8830_v36  ;;  %7561 = vmatprep.mubr.msk.f32.mxu0 %vm8001_vm0, %v8002_v1 }
 0x933   : > { %7557 = vmatmul.mubr.msk.f32.vlgmr.msra.gmra.mrb[52].mxu1 %vm570_vm2, %v4381_v35  ;;  %7569 = vmatprep.subr.mxu0 %v8002_v1 }
 0x934   : > { %7565 = vmatpush3.msra.mxu1 %v4961_v44  ;;  %7566 = vmatprep.mubr.msk.f32.mxu1 %vm8001_vm0, %v8002_v1 }
 0x935   : > { %7562 = vmatmul.mubr.msk.f32.vlgmr.msra.gmra.mrb[56].mxu0 %vm570_vm2, %v4383_v48  ;;  %7574 = vmatprep.subr.mxu1 %v8002_v1 }
 0x936   : > { %7571 = vmatprep.mubr.msk.f32.mxu0 %vm8001_vm0, %v8002_v1  ;;  %7570 = vmatpush3.msra.mxu0 %v518_v57 }
 0x937   : > { %7567 = vmatmul.mubr.msk.f32.vlgmr.msra.gmra.mrb[54].mxu1 %vm570_vm2, %v4333_v47  ;;  %7579 = vmatprep.subr.mxu0 %v8002_v1 }
 0x938   : > { %7576 = vmatprep.mubr.msk.f32.mxu1 %vm8001_vm0, %v8002_v1 }
 0x93b   : > { %7575 = vmatpush3.xpose.msk.msra.mxu1 %vm570_vm2, %v8853_v51 }
 0x93c   : > { %7584 = vmatprep.subr.mxu1 %v8002_v1 }
 0x93e   : > { %7577 = vmatmul.mubr.msk.f32.vlgmr.msra.gmra.mrb[56].mxu1 %vm570_vm2, %v5133_v27 }
 0x93f   : > { %7585 = vmatpush3.xpose.msk.msra.mxu1 %vm570_vm2, %v8778_v26  ;;  %7586 = vmatprep.mubr.msk.f32.mxu1 %vm8001_vm0, %v8002_v1 }
 0x940   : > { %7594 = vmatprep.subr.mxu1 %v8002_v1 }
 0x942   : > { %7587 = vmatmul.mubr.msk.f32.vlgmr.msra.gmra.mrb[58].mxu1 %vm570_vm2, %v5281_v38 }
 0x943   : > { %7595 = vmatpush3.xpose.msk.msra.mxu1 %vm570_vm2, %v8798_v24  ;;  %7596 = vmatprep.mubr.msk.f32.mxu1 %vm8001_vm0, %v8002_v1 }
 0x944   : > { %7604 = vmatprep.subr.mxu1 %v8002_v1 }
 0x946   : > { %7597 = vmatmul.mubr.msk.f32.vlgmr.msra.gmra.mrb[60].mxu1 %vm570_vm2, %v5429_v52 }
 0x947   : > { %7605 = vmatpush3.xpose.msk.msra.mxu1 %vm570_vm2, %v8820_v37  ;;  %7606 = vmatprep.mubr.msk.f32.mxu1 %vm8001_vm0, %v8002_v1 }
 0x948   : > { %7614 = vmatprep.subr.mxu1 %v8002_v1 }
 0x94a   : > { %7607 = vmatmul.mubr.msk.f32.vlgmr.msra.gmra.mrb[62].mxu1 %vm570_vm2, %v5577_v53 }
 0x94b   : > { %7615 = vmatpush3.xpose.msk.msra.mxu1 %vm570_vm2, %v5727_v54  ;;  %7616 = vmatprep.mubr.msk.f32.mxu1 %vm8001_vm0, %v8002_v1 }
 0x94c   : > { %7624 = vmatprep.subr.mxu1 %v8002_v1 }
 0x94e   : > { %7617 = vmatmul.mubr.msk.f32.vlgmr.msra.gmra.mrb[64].mxu1 %vm570_vm2, %v5725_v55 }
 0x94f   : > { %7625 = vmatpush3.msra.mxu1 %v7835_v56  ;;  %7626 = vmatprep.mubr.msk.f32.mxu1 %vm8001_vm0, %v8002_v1 }
 0x950   : > { %7634 = vmatprep.subr.mxu1 %v8002_v1 }
 0x9fa   : > { %v4452_v58 = vpop.f32.mrb[46].mxu1 }
 0x9fb   : > { %v7528_v59 = vpop.f32.mrb[47].mxu1 }
 0x9fc   : > { %v4524_v60 = vpop.f32.mrb[50].mxu0 }
 0x9fd   : > { %v4971_v61 = vrot.slane %v4524_v60, 7  ;;  %v7533_v63 = vpop.f32.mrb[51].mxu0 }
 0x9fe   : > { %v4596_v2 = vpop.f32.mrb[48].mxu1 }
 0x9ff   : > { %v4972_v3 = vsel %vm1182_vm3, %v4971_v61, %v4452_v58  ;;  %v4973_v4 = vrot.slane %v4596_v2, 6  ;;  %v7538_v5 = vpop.f32.mrb[49].mxu1 }
 0xa00   : > { %v4668_v6 = vpop.f32.mrb[52].mxu0 }
 0xa01   : > { %v4974_v7 = vsel %vm1185_vm4, %v4973_v4, %v4972_v3  ;;  %v4975_v8 = vrot.slane %v4668_v6, 5  ;;  %v7543_v11 = vpop.f32.mrb[53].mxu0 }
 0xa02   : > { %v4740_v12 = vpop.f32.mrb[50].mxu1 }
 0xa03   : > { %v4976_v13 = vsel %vm1188_vm5, %v4975_v8, %v4974_v7  ;;  %v4977_v16 = vrot.slane %v4740_v12, 4  ;;  %v7548_v18 = vpop.f32.mrb[51].mxu1 }
 0xa04   : > { %v4812_v20 = vpop.f32.mrb[54].mxu0 }
 0xa05   : > { %v4978_v22 = vsel %vm1191_vm6, %v4977_v16, %v4976_v13  ;;  %v4979_v25 = vrot.slane %v4812_v20, 3  ;;  %v7553_v45 = vpop.f32.mrb[55].mxu0 }
 0xa06   : > { %v4884_v34 = vpop.f32.mrb[52].mxu1 }
 0xa07   : > { %v4980_v47 = vsel %vm1194_vm7, %v4979_v25, %v4978_v22  ;;  %v4981_v23 = vrot.slane %v4884_v34, 2  ;;  %v7558_v29 = vpop.f32.mrb[53].mxu1 }
 0xa08   : > { %v4956_v28 = vpop.f32.mrb[56].mxu0 }
 0xa09   : > { %v4983_v40 = vrot.slane %v4956_v28, 1  ;;  %v7563_v46 = vpop.f32.mrb[57].mxu0  ;;  %v4982_v33 = vsel %vm1197_vm8, %v4981_v23, %v4980_v47 }
 0xa0a   : > { %v5054_v41 = vpop.f32.mrb[54].mxu1 }
 0xa0b   : > { %v4984_v9 = vsel %vm1200_vm9, %v4983_v40, %v4982_v33  ;;  %v7568_v43 = vpop.f32.mrb[55].mxu1 }
 0xa0c   : > { %v5055_v62 = vadd.f32 %v5054_v41, %v4984_v9 }
 0xa0e   : > { %7572 = vmatmul.mubr.msk.f32.vlgmr.msra.gmra.mrb[58].mxu0 %vm570_vm2, %v5055_v62 }
 0xa0f   : > { %7580 = vmatpush3.xpose.msk.msra.mxu0 %vm570_vm2, %v7835_v56  ;;  %7581 = vmatprep.mubr.msk.f32.mxu0 %vm8001_vm0, %v8002_v1 }
 0xa10   : > { %7589 = vmatprep.subr.mxu0 %v8002_v1 }
 0xa11   : > { %v5202_v27 = vpop.f32.mrb[56].mxu1 }
 0xa12   : > { %v7578_v32 = vpop.f32.mrb[57].mxu1  ;;  %7582 = vmatmul.mubr.msk.f32.vlgmr.msra.gmra.mrb[60].mxu0 %vm570_vm2, %v8839_v49 }
 0xa13   : > { %7590 = vmatpush3.xpose.msk.msra.mxu0 %vm570_vm2, %v8788_v42  ;;  %7591 = vmatprep.mubr.msk.f32.mxu0 %vm8001_vm0, %v8002_v1 }
 0xa14   : > { %7599 = vmatprep.subr.mxu0 %v8002_v1 }
 0xa15   : > { %v5350_v35 = vpop.f32.mrb[58].mxu1 }
 0xa16   : > { %v7588_v44 = vpop.f32.mrb[59].mxu1  ;;  %7592 = vmatmul.mubr.msk.f32.vlgmr.msra.gmra.mrb[62].mxu0 %vm570_vm2, %v8848_v50  ;;  %v5738_v59 = vrot.slane %v5350_v35, 6 }
 0xa17   : > { %7600 = vmatpush3.xpose.msk.msra.mxu0 %vm570_vm2, %v8809_v30  ;;  %7601 = vmatprep.mubr.msk.f32.mxu0 %vm8001_vm0, %v8002_v1 }
 0xa18   : > { %7609 = vmatprep.subr.mxu0 %v8002_v1 }
 0xa19   : > { %v5498_v48 = vpop.f32.mrb[60].mxu1 }
 0xa1a   : > { %v7598_v49 = vpop.f32.mrb[61].mxu1  ;;  %7602 = vmatmul.mubr.msk.f32.vlgmr.msra.gmra.mrb[64].mxu0 %vm570_vm2, %v8864_v39  ;;  %v5742_v2 = vrot.slane %v5498_v48, 4 }
 0xa1b   : > { %7610 = vmatpush3.xpose.msk.msra.mxu0 %vm570_vm2, %v8830_v36  ;;  %7611 = vmatprep.mubr.msk.f32.mxu0 %vm8001_vm0, %v8002_v1 }
 0xa1c   : > { %7619 = vmatprep.subr.mxu0 %v8002_v1 }
 0xa1d   : > { %v5646_v38 = vpop.f32.mrb[62].mxu1 }
 0xa1e   : > { %v7608_v50 = vpop.f32.mrb[63].mxu1  ;;  %7612 = vmatmul.mubr.msk.f32.vlgmr.msra.gmra.mrb[66].mxu0 %vm570_vm2, %v8873_v10  ;;  %v5746_v7 = vrot.slane %v5646_v38, 2 }
 0xa1f   : > { %7620 = vmatpush3.msra.mxu0 %v8853_v51  ;;  %7621 = vmatprep.mubr.msk.f32.mxu0 %vm8001_vm0, %v8002_v1 }
 0xa20   : > { %7629 = vmatprep.subr.mxu0 %v8002_v1 }
 0xa21   : > { %v5821_v52 = vpop.f32.mrb[64].mxu1 }
 0xa22   : > { %v7618_v39 = vpop.f32.mrb[65].mxu1 }
 0xae1   : > { %v5127_v53 = vpop.f32.mrb[58].mxu0 }
 0xae2   : > { %v8933_v54 = vadd.f32 %v5127_v53, %v8747_v31  ;;  %v7573_v55 = vpop.f32.mrb[59].mxu0 }
 0xae5   : > { %v5276_v56 = vpop.f32.mrb[60].mxu0 }
 0xae6   : > { %v5736_v57 = vrot.slane %v5276_v56, 7  ;;  %v7583_v58 = vpop.f32.mrb[61].mxu0 }
 0xae8   : > { %v5737_v10 = vsel %vm1182_vm3, %v5736_v57, %v5202_v27 }
 0xae9   : > { %v5424_v60 = vpop.f32.mrb[62].mxu0  ;;  %v5739_v51 = vsel %vm1185_vm4, %v5738_v59, %v5737_v10 }
 0xaea   : > { %v5740_v61 = vrot.slane %v5424_v60, 5  ;;  %v7593_v63 = vpop.f32.mrb[63].mxu0 }
 0xaec   : > { %v5741_v3 = vsel %vm1188_vm5, %v5740_v61, %v5739_v51 }
 0xaed   : > { %v5572_v4 = vpop.f32.mrb[64].mxu0  ;;  %v5743_v5 = vsel %vm1191_vm6, %v5742_v2, %v5741_v3 }
 0xaee   : > { %v5744_v31 = vrot.slane %v5572_v4, 3  ;;  %v7603_v6 = vpop.f32.mrb[65].mxu0 }
 0xaf0   : > { %v5745_v8 = vsel %vm1194_vm7, %v5744_v31, %v5743_v5 }
 0xaf1   : > { %v5720_v11 = vpop.f32.mrb[66].mxu0  ;;  %v5747_v12 = vsel %vm1197_vm8, %v5746_v7, %v5745_v8 }
 0xaf2   : > { %v5748_v13 = vrot.slane %v5720_v11, 1  ;;  %v7613_v16 = vpop.f32.mrb[67].mxu0 }
 0xaf4   : > { %v5749_v18 = vsel %vm1200_vm9, %v5748_v13, %v5747_v12 }
 0xaf5   : > { %v5822_v20 = vadd.f32 %v5821_v52, %v5749_v18 }
 0xaf7   : > { %v5825_v22 = vmul.f32 0.35355338, %v5822_v20 }
 0xaf9   : > { %v5826_v25 = vadd.f32 %v5825_v22, %v8448_v21  ;;  %v9006_v22 = vld [vmem:[%s9118_s9] sm:$0x3f] }
 0xafb   : > { %v5827_v45 = vsel %vm570_vm2, %v5826_v25, -inf }
 0xafc   : > { %5828 = vmax.xlane.f32.xlu0 %v5827_v45 }
 0xb12   : > { %6464 = vrot.lane.b32.xlu0 %v8305_v19, %s8015_s26  ;;  %s414_s26 = scalar_lea.vmem [#allocation8], %s6982_s25  ;;  %s7927_s25 = sshll.u32 %s8016_s17, 4  ;;  %s7928_s25 = int_to_ptr.vmem [resolvable:$false] %s7927_s25 }
 0xb13   : > { %s6876_s18 = sshll.u32 %s414_s26, 4  ;;  %s7929_s22 = scalar_lea.vmem %s7928_s25, 256  ;;  %s9066_s18 = int_to_ptr.vmem [resolvable:$true] %s6876_s18 }
 0xb14   : > { %s7923_s21 = scalar_lea.vmem %s9066_s18, 128  ;;  %p7930_p9 = scmp.lt.s32.totalorder %s9066_s18, %s7928_s25 }
 0xb15   : > { %p7924_p0 = scmp.ne.s32.totalorder %s9066_s18, %s7923_s21  ;;  %p7931_p12 = scmp.lt.s32.totalorder %s7929_s22, %s7923_s21 }
 0xb17   : > { %p7925_p3 = pnand %p7924_p0, %p9137_p1  ;;  %p7932_p2 = por %p7931_p12, %p7930_p9 }
 0xb19   : > { %p7926_p7 = pneg %p7925_p3 }
 0xb1b   : > { %p7933_p13 = pnand %p7932_p2, %p7926_p7 }
 0xb89   : > { %v5829_v34 = vpop.xlane.xlu0 %5828 }
 0xb8a   : > { %v5830_v47 = vsub.f32 %v5826_v25, %v5829_v34  ;;  %v6639_v25 = vrot.slane %v9006_v22, %v8445_v14 }
 0xb8c   : > { %v5831_v23 = vmul.f32 1.442695, %v5830_v47 }
 0xb8e   : > { %7820 = vpow2.f32 %v5831_v23 }
 0xb98   : > { %v7821_v29 = vpop.eup %7820 }
 0xb99   : > { %v5833_v28 = vsel %vm570_vm2, %v7821_v29, 0.0 }
 0xb9a   : > { %5834 = vadd.xlane.f32.xlu1 %v5833_v28 }
 0xc27   : > { %v5835_v40 = vpop.xlane.xlu1 %5834 }
 0xc28   : > { %7822 = vrcp.f32 %v5835_v40 }
 0xc32   : > { %v7823_v46 = vpop.eup %7822 }
 0xc33   : > { %v5837_v33 = vmul.f32 %v7823_v46, %v7821_v29  ;;  %v7836_v29 = vld [vmem:[%s8247_s12] sm:$0xff] }
 0xc35   : > { %v5846_v21 = vrot.slane %v5837_v33, %v8303_v17  ;;  %v5839_v41 = vcombine.high %v5837_v33, %v5837_v33 }
 0xc37   : > { %v5862_v9 = vrot.slane %v5846_v21, %v8303_v17  ;;  %v5854_v43 = vcombine.high %v5846_v21, %v5846_v21  ;;  %v5853_v62 = vrot.slane %v5839_v41, %v8303_v17 }
 0xc39   : > { %7622 = vmatmul.mubr.msk.f32.vlgmr.msra.gmra.mrb[68].mxu0 %vm570_vm2, %v5862_v9  ;;  %v5876_v19 = vrot.slane %v5854_v43, %v8303_v17  ;;  %v5884_v27 = vcombine.high %v5862_v9, %v5862_v9  ;;  %v5855_v35 = vcombine.high %v5853_v62, %v5853_v62  ;;  %v6666_v9 = vld [vmem:[#allocation7] sm:$0xff]  ;;  %v6667_v43 = vld [vmem:[#allocation7 + $0x8] sm:$0xff] }
 0xc3a   : > { %7630 = vmatpush3.msra.mxu0 %v8778_v26  ;;  %7631 = vmatprep.mubr.msk.f32.mxu0 %vm8001_vm0, %v8002_v1  ;;  %v5869_v26 = vrot.slane %v5853_v62, %v8303_v17  ;;  %v7706_v14 = vpack.c.bf16 %v6667_v43, %v6666_v9 }
 0xc3b   : > { %7627 = vmatmul.mubr.msk.f32.vlgmr.msra.gmra.mrb[66].mxu1 %vm570_vm2, %v5876_v19  ;;  %7639 = vmatprep.subr.mxu0 %v8002_v1  ;;  %v5886_v32 = vcombine.high %v5876_v19, %v5876_v19  ;;  %v6668_v19 = vld [vmem:[#allocation7 + $0x10] sm:$0xff] }
 0xc3c   : > { %7635 = vmatpush3.msra.mxu1 %v8788_v42  ;;  %7636 = vmatprep.mubr.msk.f32.mxu1 %vm8001_vm0, %v8002_v1  ;;  %v5883_v42 = vrot.slane %v5855_v35, %v8303_v17  ;;  %v6753_v35 = vld [vmem:[%s9117_s8 + $0x10] sm:$0xff] }
 0xc3d   : > { %7632 = vmatmul.mubr.msk.f32.vlgmr.msra.gmra.mrb[70].mxu0 %vm570_vm2, %v5884_v27  ;;  %7644 = vmatprep.subr.mxu1 %v8002_v1  ;;  %v6751_v27 = vld [vmem:[%s9117_s8] sm:$0xff] }
 0xc3e   : > { %7640 = vmatpush3.msra.mxu0 %v8798_v24  ;;  %7641 = vmatprep.mubr.msk.f32.mxu0 %vm8001_vm0, %v8002_v1  ;;  %v5885_v24 = vcombine.high %v5869_v26, %v5869_v26  ;;  %v5887_v17 = vcombine.high %v5883_v42, %v5883_v42 }
 0xc3f   : > { %7637 = vmatmul.mubr.msk.f32.vlgmr.msra.gmra.mrb[68].mxu1 %vm570_vm2, %v5886_v32  ;;  %7649 = vmatprep.subr.mxu0 %v8002_v1  ;;  %v6752_v32 = vld [vmem:[%s9117_s8 + $0x8] sm:$0xff] }
 0xc40   : > { %7645 = vmatpush3.msra.mxu1 %v8809_v30  ;;  %7646 = vmatprep.mubr.msk.f32.mxu1 %vm8001_vm0, %v8002_v1  ;;  %v6465_v30 = vpop.permute.xlu0 %6464 }
 0xc41   : > { %7642 = vmatmul.mubr.msk.f32.vlgmr.msra.gmra.mrb[72].mxu0 %vm570_vm2, %v5869_v26  ;;  %7654 = vmatprep.subr.mxu1 %v8002_v1  ;;  %v7712_v26 = vpack.c.bf16 %v6752_v32, %v6751_v27 }
 0xc42   : > { %7650 = vmatpush3.msra.mxu0 %v8820_v37  ;;  %7651 = vmatprep.mubr.msk.f32.mxu0 %vm8001_vm0, %v8002_v1  ;;  %v519_v37 = vld [vmem:[#allocation5 + $0x18] sm:$0xff] }
 0xc43   : > { %7647 = vmatmul.mubr.msk.f32.vlgmr.msra.gmra.mrb[70].mxu1 %vm570_vm2, %v5883_v42  ;;  %7659 = vmatprep.subr.mxu0 %v8002_v1  ;;  %v6754_v42 = vld [vmem:[%s9117_s8 + $0x18] sm:$0xff] }
 0xc44   : > { %7655 = vmatpush3.msra.mxu1 %v8830_v36  ;;  %7656 = vmatprep.mubr.msk.f32.mxu1 %vm8001_vm0, %v8002_v1 }
 0xc45   : > { %7652 = vmatmul.mubr.msk.f32.vlgmr.msra.gmra.mrb[74].mxu0 %vm570_vm2, %v5885_v24  ;;  %7664 = vmatprep.subr.mxu1 %v8002_v1  ;;  %v7715_v24 = vpack.c.bf16 %v6754_v42, %v6753_v35 }
 0xc46   : > { %7660 = vmatpush3.msra.mxu0 %v6465_v30  ;;  %7661 = vmatprep.mubr.msk.f32.mxu0 %vm8001_vm0, %v8002_v1  ;;  %v6755_v30 = vld [vmem:[%s9117_s8 + $0x20] sm:$0xff] }
 0xc47   : > { %7657 = vmatmul.mubr.msk.f32.vlgmr.msra.gmra.mrb[72].mxu1 %vm570_vm2, %v5887_v17  ;;  %7705 = vmatprep.subr.bf16.mxu0 %v8000_v0  ;;  %v6756_v17 = vld [vmem:[%s9117_s8 + $0x28] sm:$0xff] }
 0xc48   : > { %7666 = vmatprep.mubr.msk.f32.mxu1 %vm8001_vm0, %v8002_v1  ;;  %7665 = vmatpush3.msra.mxu1 %v519_v37  ;;  %v7718_v37 = vpack.c.bf16 %v6756_v17, %v6755_v30 }
 0xc49   : > { %7662 = vmatmul.mubr.msk.f32.vlgmr.msra.gmra.mrb[76].mxu0 %vm570_vm2, %v5837_v33  ;;  %7711 = vmatprep.subr.bf16.mxu1 %v8000_v0 }
 0xc4a   : > { %7677 = vmatprep.mubr.msk.f32.mxu0 %vm8001_vm0, %v8002_v1  ;;  %7707 = vmatpush3.bf16.msra.mxu0 %v7706_v14 }
 0xc4b   : > { %7708 = vmatprep.subr.bf16.mxu0 %v8000_v0 }
 0xd0c   : > { %v5956_v36 = vpop.f32.mrb[68].mxu0 }
 0xd0d   : > { %v7623_v44 = vpop.f32.mrb[69].mxu0 }
 0xd0e   : > { %v6028_v48 = vpop.f32.mrb[66].mxu1 }
 0xd0f   : > { %v6475_v49 = vrot.slane %v6028_v48, 7  ;;  %v7628_v38 = vpop.f32.mrb[67].mxu1 }
 0xd10   : > { %v6100_v50 = vpop.f32.mrb[70].mxu0  ;;  %v6663_v38 = vsub.s32 2, %v8297_v15 }
 0xd11   : > { %v6476_v52 = vsel %vm1182_vm3, %v6475_v49, %v5956_v36  ;;  %v6477_v39 = vrot.slane %v6100_v50, 6  ;;  %v7633_v53 = vpop.f32.mrb[71].mxu0  ;;  %v6658_v49 = vsub.s32 1, %v8297_v15 }
 0xd12   : > { %v6172_v55 = vpop.f32.mrb[68].mxu1  ;;  %v6664_v53 = vrot.slane %v9006_v22, %v6663_v38 }
 0xd13   : > { %v6478_v56 = vsel %vm1185_vm4, %v6477_v39, %v6476_v52  ;;  %v6479_v57 = vrot.slane %v6172_v55, 5  ;;  %v7638_v58 = vpop.f32.mrb[69].mxu1  ;;  %v6659_v50 = vrot.slane %v9006_v22, %v6658_v49 }
 0xd14   : > { %v6244_v59 = vpop.f32.mrb[72].mxu0 }
 0xd15   : > { %v6480_v10 = vsel %vm1188_vm5, %v6479_v57, %v6478_v56  ;;  %v6481_v60 = vrot.slane %v6244_v59, 4  ;;  %v7643_v51 = vpop.f32.mrb[73].mxu0  ;;  %v6758_v57 = vld [vmem:[%s9117_s8 + $0x38] sm:$0xff]  ;;  %v7100_v59 = vld [vmem:[%s9116_s7] ss:$0 sm:$0xff] }
 0xd16   : > { %v6316_v61 = vpop.f32.mrb[70].mxu1 }
 0xd17   : > { %v6482_v63 = vsel %vm1191_vm6, %v6481_v60, %v6480_v10  ;;  %v6483_v2 = vrot.slane %v6316_v61, 3  ;;  %v7648_v3 = vpop.f32.mrb[71].mxu1 }
 0xd18   : > { %v6388_v4 = vpop.f32.mrb[74].mxu0 }
 0xd19   : > { %v6484_v5 = vsel %vm1194_vm7, %v6483_v2, %v6482_v63  ;;  %v6485_v31 = vrot.slane %v6388_v4, 2  ;;  %v7653_v6 = vpop.f32.mrb[75].mxu0  ;;  %v6761_v63 = vsub.s32 5, %v8297_v15 }
 0xd1a   : > { %v6460_v7 = vpop.f32.mrb[72].mxu1 }
 0xd1b   : > { %v6487_v8 = vrot.slane %v6460_v7, 1  ;;  %v7658_v11 = vpop.f32.mrb[73].mxu1  ;;  %v6486_v12 = vsel %vm1197_vm8, %v6485_v31, %v6484_v5  ;;  %v6762_v2 = vrot.slane %v9006_v22, %v6761_v63 }
 0xd1c   : > { %v6558_v13 = vpop.f32.mrb[76].mxu0 }
 0xd1d   : > { %v6488_v16 = vsel %vm1200_vm9, %v6487_v8, %v6486_v12  ;;  %v7663_v18 = vpop.f32.mrb[77].mxu0 }
 0xd1e   : > { %v6559_v20 = vadd.f32 %v6558_v13, %v6488_v16 }
 0xd20   : > { %7667 = vmatmul.mubr.msk.f32.vlgmr.msra.gmra.mrb[74].mxu1 %vm570_vm2, %v6559_v20 }
 0xd21   : > { %7696 = vmatprep.mubr.msk.f32.mxu1 %vm8001_vm0, %v8002_v1  ;;  %7713 = vmatpush3.bf16.msra.mxu1 %v7712_v26 }
 0xd22   : > { %7714 = vmatprep.subr.bf16.mxu1 %v8000_v0 }
 0xd25   : > { %7716 = vmatpush3.bf16.msra.mxu1 %v7715_v24 }
 0xd26   : > { %7717 = vmatprep.subr.bf16.mxu1 %v8000_v0 }
 0xd29   : > { %7719 = vmatpush3.bf16.msra.mxu1 %v7718_v37 }
 0xd2a   : > { %7720 = vmatprep.subr.bf16.mxu1 %v8000_v0  ;;  %v6757_v0 = vld [vmem:[%s9117_s8 + $0x30] sm:$0xff] }
 0xd2b   : > { %v7721_v58 = vpack.c.bf16 %v6758_v57, %v6757_v0 }
 0xd2d   : > { %7722 = vmatpush3.bf16.msra.mxu1 %v7721_v58 }
 0xdf3   : > { %v6631_v45 = vpop.f32.mrb[74].mxu1 }
 0xdf4   : > { %v6635_v34 = vadd.f32 %v6631_v45, %v8933_v54  ;;  %v7668_v47 = vpop.f32.mrb[75].mxu1  ;;  %v6669_v54 = vld [vmem:[#allocation7 + $0x18] sm:$0xff]  ;;  %v6858_v45 = vsub.s32 4, %v8297_v15 }
 0xdf5   : > { %v7709_v62 = vpack.c.bf16 %v6669_v54, %v6668_v19 }
 0xdf6   : > { %v6640_v23 = vadd.f32 %v6639_v25, %v6635_v34  ;;  %v6853_v25 = vsub.s32 3, %v8297_v15 }
 0xdf7   : > { %7710 = vmatpush3.bf16.msra.mxu0 %v7709_v62 }
 0xdf8   : > { %v6641_v28 = vadd.f32 %v7836_v29, %v6640_v23  ;;  %v6854_v34 = vrot.slane %v9006_v22, %v6853_v25  ;;  %v6859_v29 = vrot.slane %v9006_v22, %v6858_v45 }
 0xdfa   : > { %v6642_v40 = vsel %vm440_vm1, %v6641_v28, 0.0 }
 0xdfb   : > { %6643 = vadd.xlane.f32.xlu1 %v6642_v40 }
 0xe88   : > { %v6644_v46 = vpop.xlane.xlu1 %6643 }
 0xe89   : > { %v6646_v1 = vmul.f32 0.03125, %v6644_v46 }
 0xe8b   : > { %v6647_v33 = vsub.f32 %v6641_v28, %v6646_v1 }
 0xe8d   : > { %v6648_v21 = vmul.f32 %v6647_v33, %v6647_v33 }
 0xe8f   : > { %v6649_v41 = vsel %vm440_vm1, %v6648_v21, 0.0 }
 0xe90   : > { %6650 = vadd.xlane.f32.xlu1 %v6649_v41 }
 0xf1d   : > { %v6651_v36 = vpop.xlane.xlu1 %6650 }
 0xf1e   : > { %v6652_v44 = vmul.f32 0.03125, %v6651_v36 }
 0xf20   : > { %v6653_v48 = vadd.f32 1e-05, %v6652_v44 }
 0xf22   : > { %7824 = vrsqrt.f32 %v6653_v48 }
 0xf2c   : > { %v7825_v52 = vpop.eup %7824 }
 0xf2d   : > { %v6655_v39 = vmul.f32 %v7825_v52, %v6647_v33 }
 0xf2f   : > { %v6660_v55 = vmul.f32 %v6659_v50, %v6655_v39 }
 0xf31   : > { %v6665_v56 = vadd.f32 %v6664_v53, %v6660_v55 }
 0xf33   : > { %7678 = vmatmul.mubr.msk.f32.vlgmr.msra.gmra.mrb[78].mxu0 %vm440_vm1, %v6665_v56 }
0x1006   : > { %v6746_v10 = vpop.f32.mrb[78].mxu0 }
0x1007   : > { %v6747_v60 = vadd.f32 %v7100_v59, %v6746_v10  ;;  %v7679_v51 = vpop.f32.mrb[79].mxu0 }
0x1009   : > { %v6750_v61 = vmax.f32 %v6747_v60, 0.0 }
0x100b   : > { %7697 = vmatmul.mubr.msk.f32.vlgmr.msra.gmra.mrb[76].mxu1 %vm6763_vm11, %v6750_v61 }
0x10de   : > { %v6833_v3 = vpop.f32.mrb[76].mxu1 }
0x10df   : > { %v6834_v4 = vadd.f32 %v6833_v3, %v6762_v2  ;;  %v7698_v5 = vpop.f32.mrb[77].mxu1 }
0x10e1   : > { %v6837_v31 = vadd.f32 %v6834_v4, %v6665_v56 }
0x10e3   : > { %v6838_v6 = vsel %vm440_vm1, %v6837_v31, 0.0 }
0x10e4   : > { %6839 = vadd.xlane.f32.xlu1 %v6838_v6 }
0x1171   : > { %v6840_v7 = vpop.xlane.xlu1 %6839 }
0x1172   : > { %v6841_v8 = vmul.f32 0.03125, %v6840_v7 }
0x1174   : > { %v6842_v11 = vsub.f32 %v6837_v31, %v6841_v8 }
0x1176   : > { %v6843_v12 = vmul.f32 %v6842_v11, %v6842_v11 }
0x1178   : > { %v6844_v13 = vsel %vm440_vm1, %v6843_v12, 0.0 }
0x1179   : > { %6845 = vadd.xlane.f32.xlu1 %v6844_v13 }
0x1206   : > { %v6846_v16 = vpop.xlane.xlu1 %6845 }
0x1207   : > { %v6847_v18 = vmul.f32 0.03125, %v6846_v16 }
0x1209   : > { %v6848_v20 = vadd.f32 1e-05, %v6847_v18 }
0x120b   : > { %7826 = vrsqrt.f32 %v6848_v20 }
0x1215   : > { %v7827_v47 = vpop.eup %7826 }
0x1216   : > { %v6850_v23 = vmul.f32 %v7827_v47, %v6842_v11 }
0x1218   : > { %v6855_v28 = vmul.f32 %v6854_v34, %v6850_v23 }
0x121a   : > { %v6860_v40 = vadd.f32 %v6859_v29, %v6855_v28 }
0x121c   : > { %6861 = vst.msk [vmem:[%s414_s26] sm:$0xff] %vm440_vm1, %v6860_v40 }
0x121d   : > { %7936 = shalt.err (!%p7933_p13)
}
0x121e   : > { %s7937_s29 = scalar_lea.hbm %s9064_s23, 128  ;;  %s7941_s24 = scalar_lea.hbm %s9119_s10, 256 }
0x121f   : > { %p7938_p6 = scmp.ne.s32.totalorder %s9064_s23, %s7937_s29  ;;  %p7942_p5 = scmp.lt.u32.totalorder %s9064_s23, %s9119_s10 }
0x1220   : > { %p7943_p8 = scmp.lt.u32.totalorder %s7941_s24, %s7937_s29  ;;  %p7945_p0 = scmp.lt.u32.totalorder %s7937_s29, %s9064_s23 }
0x1221   : > { %p7939_p10 = pnand %p7938_p6, %p9137_p1 }
0x1222   : > { %p7944_p11 = por %p7943_p8, %p7942_p5 }
0x1223   : > { %p7940_p4 = pneg %p7939_p10 }
0x1224   : > { %p7946_p3 = por %p7945_p0, %p7944_p11 }
0x1226   : > { %p7947_p7 = pnand %p7946_p3, %p7940_p4 }
0x1228   : > { %7950 = shalt.err (!%p7947_p7)
}
0x1229   : > { %7733 = dma.vmem_to_hbm [thread:$0]  (%p9137_p1), %s9066_s18, 128, %s9064_s23, %s6863_s19  }
0x122a PF: > { %s9138_s12 = sld [smem:[#allocation12_spill]]  ;;  %s9139_s21 = sld [smem:[#allocation13_spill]] }
0x122b   : > { %p9141_p12 = scmp.ge.s32.totalorder %s7993_s16, 2 }
0x1230   : > { %s6888_s17 = sand.u32 1, %s9138_s12   ;;  %p9140_p9 = scmp.ne.s32.totalorder %s9139_s21, 0 }
0x1231   : > { %s6889_s25 = scalar_lea.sflag [#allocation4], %s6888_s17 }
0x1232   : > { %p7747_p2 = pnand %p9141_p12, %p9140_p9 }
0x1234   : > { %7976 = dma.done.wait (!%p7747_p2), %s6889_s25, 128  }
0x1235   : > { %7978 = vsyncadd (!%p7747_p2), %s6889_s25, 4294967168  ;;  %p24_p13 = scmp.ge.s32.totalorder %s8182_s28, 4   ;;  %s9142_s13 = smov %s7985_s14 }
0x1236   : > { %s9143_s14 = smov %s7989_s15  ;;  %s9144_s15 = smov %s8198_s11 }
0x1237   : > { %s9145_s16 = smov %s8182_s28  ;;  %26 = sbr.rel (!%p24_p13) target bundleno = 6 (0x6), region = 116 }
0x123e   :  { %6894 = vsyncpa [#allocation3], 1 }
0x123f   :  { %6896 = vsyncpa [#allocation3 + $0x1], 1 }
0x1240   :  { %6897 = vsyncpa [#allocation6], 1 }
0x1241   :  { %6898 = vsyncpa [#allocation4], 1 }
0x1242   :  { %6900 = vsyncpa [#allocation4 + $0x1], 1 }

</bundles_post_ra>
